<compile_context>
chip_gen: v5e
topology: v5e:2x2
jax: 0.10.0
libtpu: 0.0.40
codegen_flags: <defaults>
</compile_context>

<pallas_src>
import functools
import math

import jax
import jax.numpy as jnp
import numpy as np
from jax.experimental import pallas as pl
from jax.experimental.pallas import tpu as pltpu


# ----------------------------------------------------------------------------
# Host-side parameter preparation (tiny, done once, outside the hot path)
# ----------------------------------------------------------------------------
def _nearest_idx(in_size, scale):
    """PyTorch F.interpolate(mode='nearest') source-index map."""
    out_size = int(math.floor(in_size * scale))
    inv = np.float32(1.0 / scale)                       # ATen: float(1.0/scale)
    dst = np.arange(out_size, dtype=np.float32)
    src = np.floor(dst * inv).astype(np.int64)
    return np.minimum(src, in_size - 1)                 # (out_size,)


def _build_layer(w, b, stride, pad, rowmap, colmap, in_h, in_w):
    """Build (A_dj, S_dj, bias_col) for one conv (+ fused upsample/padding).

    Stored input layout is 2-D (C_in*in_h, in_w).  rowmap/colmap map the
    conceptual (post-upsample, pre-pad) coordinates onto stored coordinates.
    """
    w = np.asarray(w, np.float32)
    b = np.asarray(b, np.float32)
    Co, Ci, kh, kw = w.shape
    Hc, Wc = len(rowmap), len(colmap)                   # conceptual input size
    Ho = (Hc + 2 * pad - kh) // stride + 1
    Wo = (Wc + 2 * pad - kw) // stride + 1

    A = np.zeros((kw, Co * Ho, Ci * in_h), np.float32)
    S = np.zeros((kw, in_w, Wo), np.float32)
    for dj in range(kw):
        for x in range(Wo):
            cc = x * stride + dj - pad
            if 0 <= cc < Wc:
                S[dj, int(colmap[cc]), x] = 1.0
        for y in range(Ho):
            for di in range(kh):
                rr = y * stride + di - pad
                if 0 <= rr < Hc:
                    g = int(rowmap[rr])
                    for o in range(Co):
                        for c in range(Ci):
                            A[dj, o * Ho + y, c * in_h + g] += w[o, c, di, dj]

    bias_col = np.repeat(b, Ho)[:, None]                # (Co*Ho, 1)
    return A, S, bias_col, Ho, Wo


def prepare_params(p, H=28, W=28):
    """Lay out the PyTorch-layout parameters as matmul-ready matrices."""
    mats = []
    # conv1: 1->4, k3, s2, p1
    rm, cm = np.arange(H), np.arange(W)
    A, S, bc, Ho, Wo = _build_layer(p["w1"], p["b1"], 2, 1, rm, cm, H, W)
    mats += [A, S, bc]
    # conv2: 4->8, k3, s2, p1
    rm, cm = np.arange(Ho), np.arange(Wo)
    A, S, bc, Ho, Wo = _build_layer(p["w2"], p["b2"], 2, 1, rm, cm, Ho, Wo)
    mats += [A, S, bc]
    # nearest x2 upsample folded into conv3: 8->4, k3, s1, p1
    rm, cm = _nearest_idx(Ho, 2.0), _nearest_idx(Wo, 2.0)
    A, S, bc, Ho, Wo = _build_layer(p["w3"], p["b3"], 1, 1, rm, cm, Ho, Wo)
    mats += [A, S, bc]
    # nearest x1.99 upsample folded into conv4: 4->1, k3, s1, p1
    rm, cm = _nearest_idx(Ho, 1.99), _nearest_idx(Wo, 1.99)
    A, S, bc, Ho, Wo = _build_layer(p["w4"], p["b4"], 1, 1, rm, cm, Ho, Wo)
    mats += [A, S, bc]
    return [jnp.asarray(m) for m in mats], (Ho, Wo)


# ----------------------------------------------------------------------------
# Fused Pallas kernel: the whole network for one image per grid step
# ----------------------------------------------------------------------------
def _caep_fused_kernel(x_ref, *refs):
    o_ref = refs[-1]
    prm = refs[:-1]                                     # 4 layers x (A, S, bias)

    def layer(x2d, a_ref, s_ref, b_ref, final):
        acc = None
        for dj in range(3):
            t = jnp.dot(a_ref[dj], x2d, preferred_element_type=jnp.float32)
            t = jnp.dot(t, s_ref[dj], preferred_element_type=jnp.float32)
            acc = t if acc is None else acc + t
        acc = acc + b_ref[...]                          # (Co*Ho, 1) -> lane bcast
        acc = jnp.maximum(acc, 0.0)                     # ReLU (all layers)
        if final:
            acc = jnp.tanh(acc)                         # tanh(relu(conv4(x)))
        return acc

    h = x_ref[0, 0]                                     # (H, W), C_in = 1
    for li in range(4):
        a_ref, s_ref, b_ref = prm[3 * li], prm[3 * li + 1], prm[3 * li + 2]
        h = layer(h, a_ref, s_ref, b_ref, final=(li == 3))
    o_ref[0, 0] = h.astype(o_ref.dtype)


@functools.partial(jax.jit, static_argnames=("out_hw",))
def caep_forward(x, mats, out_hw):
    B, _, H, W = x.shape
    Ho, Wo = out_hw

    in_specs = [pl.BlockSpec((1, 1, H, W), lambda b: (b, 0, 0, 0))]
    for m in mats:                                      # whole (tiny) array, resident
        in_specs.append(pl.BlockSpec(m.shape, lambda b, _z=(0,) * m.ndim: _z))
    out_specs = pl.BlockSpec((1, 1, Ho, Wo), lambda b: (b, 0, 0, 0))

    return pl.pallas_call(
        _caep_fused_kernel,
        out_shape=jax.ShapeDtypeStruct((B, 1, Ho, Wo), jnp.float32),
        grid=(B,),
        in_specs=in_specs,
        out_specs=out_specs,
        compiler_params=pltpu.CompilerParams(
            dimension_semantics=("parallel",),          # v7x: images across both TCs
        ),
    )(x, *mats)


# ----------------------------------------------------------------------------
# Parameter init (xavier-normal weights like the PyTorch module)
# ----------------------------------------------------------------------------
def init_params(key):
    ks = jax.random.split(key, 8)
    f32 = jnp.float32

    def xavier(k, shape):
        fan_in = shape[1] * shape[2] * shape[3]
        fan_out = shape[0] * shape[2] * shape[3]
        std = float(np.sqrt(2.0 / (fan_in + fan_out)))
        return std * jax.random.normal(k, shape, f32)

    return {
        "w1": xavier(ks[0], (4, 1, 3, 3)), "b1": 0.1 * jax.random.normal(ks[1], (4,), f32),
        "w2": xavier(ks[2], (8, 4, 3, 3)), "b2": 0.1 * jax.random.normal(ks[3], (8,), f32),
        "w3": xavier(ks[4], (4, 8, 3, 3)), "b3": 0.1 * jax.random.normal(ks[5], (4,), f32),
        "w4": xavier(ks[6], (1, 4, 3, 3)), "b4": 0.1 * jax.random.normal(ks[7], (1,), f32),
    }


# ----------------------------------------------------------------------------
# Pure-JAX reference (PyTorch semantics) for the correctness check
# ----------------------------------------------------------------------------
def _conv_ref(x, w, b, stride, pad):
    out = jax.lax.conv_general_dilated(
        x, w, window_strides=(stride, stride),
        padding=[(pad, pad), (pad, pad)],
        dimension_numbers=("NCHW", "OIHW", "NCHW"))
    return out + b[None, :, None, None]


def _upsample_nearest_ref(x, scale):
    H, W = x.shape[2], x.shape[3]
    ridx = _nearest_idx(H, scale)
    cidx = _nearest_idx(W, scale)
    return x[:, :, ridx[:, None], cidx[None, :]]


def caep_ref(x, p):
    x = jax.nn.relu(_conv_ref(x, p["w1"], p["b1"], 2, 1))
    x = jax.nn.relu(_conv_ref(x, p["w2"], p["b2"], 2, 1))
    x = _upsample_nearest_ref(x, 2.0)
    x = jax.nn.relu(_conv_ref(x, p["w3"], p["b3"], 1, 1))
    x = _upsample_nearest_ref(x, 1.99)
    x = jax.nn.relu(_conv_ref(x, p["w4"], p["b4"], 1, 1))
    return jnp.tanh(x)


if __name__ == "__main__":
    key = jax.random.PRNGKey(0)
    k_x, k_p = jax.random.split(key)
    x = jax.random.normal(k_x, (2, 1, 28, 28), jnp.float32)   # MNIST-shaped input
    params = init_params(k_p)

    mats, out_hw = prepare_params(params, H=28, W=28)
    out = jax.block_until_ready(caep_forward(x, mats, out_hw))
    assert out.shape == (2, 1, out_hw[0], out_hw[1]), out.shape

    ref = jax.block_until_ready(caep_ref(x, params))
    np.testing.assert_allclose(np.asarray(out), np.asarray(ref), atol=1e-4, rtol=1e-4)

    print("KERNEL_OK")
</pallas_src>

<mosaic_0001>
module attributes {stable_mosaic.version = 11 : i64} {
  func.func @_caep_fused_kernel(%arg0: i32, %arg1: memref<1x1x28x28xf32, #tpu.memory_space<vmem>>, %arg2: memref<3x56x28xf32, #tpu.memory_space<vmem>>, %arg3: memref<3x28x14xf32, #tpu.memory_space<vmem>>, %arg4: memref<56x1xf32, #tpu.memory_space<vmem>>, %arg5: memref<3x56x56xf32, #tpu.memory_space<vmem>>, %arg6: memref<3x14x7xf32, #tpu.memory_space<vmem>>, %arg7: memref<56x1xf32, #tpu.memory_space<vmem>>, %arg8: memref<3x56x56xf32, #tpu.memory_space<vmem>>, %arg9: memref<3x7x14xf32, #tpu.memory_space<vmem>>, %arg10: memref<56x1xf32, #tpu.memory_space<vmem>>, %arg11: memref<3x27x56xf32, #tpu.memory_space<vmem>>, %arg12: memref<3x14x27xf32, #tpu.memory_space<vmem>>, %arg13: memref<27x1xf32, #tpu.memory_space<vmem>>, %arg14: memref<1x1x27x27xf32, #tpu.memory_space<vmem>>) attributes {dimension_semantics = [#tpu.dimension_semantics<parallel>], iteration_bounds = array<i64: 2>, scalar_prefetch = 0 : i64, scratch_operands = 0 : i64, tpu.core_type = #tpu.core_type<tc>, window_params = [{transform_indices = @transform_0, window_bounds = array<i64: 1, 1, 28, 28>}, {pipeline_mode = #tpu.pipeline_mode<synchronous>, transform_indices = @transform_1, window_bounds = array<i64: 3, 56, 28>}, {pipeline_mode = #tpu.pipeline_mode<synchronous>, transform_indices = @transform_2, window_bounds = array<i64: 3, 28, 14>}, {pipeline_mode = #tpu.pipeline_mode<synchronous>, transform_indices = @transform_3, window_bounds = array<i64: 56, 1>}, {pipeline_mode = #tpu.pipeline_mode<synchronous>, transform_indices = @transform_4, window_bounds = array<i64: 3, 56, 56>}, {pipeline_mode = #tpu.pipeline_mode<synchronous>, transform_indices = @transform_5, window_bounds = array<i64: 3, 14, 7>}, {pipeline_mode = #tpu.pipeline_mode<synchronous>, transform_indices = @transform_6, window_bounds = array<i64: 56, 1>}, {pipeline_mode = #tpu.pipeline_mode<synchronous>, transform_indices = @transform_7, window_bounds = array<i64: 3, 56, 56>}, {pipeline_mode = #tpu.pipeline_mode<synchronous>, transform_indices = @transform_8, window_bounds = array<i64: 3, 7, 14>}, {pipeline_mode = #tpu.pipeline_mode<synchronous>, transform_indices = @transform_9, window_bounds = array<i64: 56, 1>}, {pipeline_mode = #tpu.pipeline_mode<synchronous>, transform_indices = @transform_10, window_bounds = array<i64: 3, 27, 56>}, {pipeline_mode = #tpu.pipeline_mode<synchronous>, transform_indices = @transform_11, window_bounds = array<i64: 3, 14, 27>}, {pipeline_mode = #tpu.pipeline_mode<synchronous>, transform_indices = @transform_12, window_bounds = array<i64: 27, 1>}, {transform_indices = @transform_13, window_bounds = array<i64: 1, 1, 27, 27>}]} {
    %c0 = arith.constant 0 : index
    %c0_0 = arith.constant 0 : index
    %c0_1 = arith.constant 0 : index
    %c0_2 = arith.constant 0 : index
    %0 = vector.load %arg1[%c0, %c0_0, %c0_1, %c0_2] : memref<1x1x28x28xf32, #tpu.memory_space<vmem>>, vector<1x1x28x28xf32>
    %1 = vector.shape_cast %0 : vector<1x1x28x28xf32> to vector<28x28xf32>
    %c0_3 = arith.constant 0 : index
    %c0_4 = arith.constant 0 : index
    %c0_5 = arith.constant 0 : index
    %2 = vector.load %arg2[%c0_3, %c0_4, %c0_5] : memref<3x56x28xf32, #tpu.memory_space<vmem>>, vector<1x56x28xf32>
    %3 = vector.shape_cast %2 : vector<1x56x28xf32> to vector<56x28xf32>
    %cst = arith.constant dense<0.000000e+00> : vector<56x28xf32>
    %4 = tpu.matmul %3, %1, %cst {dimension_numbers = #tpu.dot_dimension_numbers<[1], [0], [0], [1], [0, 0, 1, 1], [], []>} : vector<56x28xf32>, vector<28x28xf32>, vector<56x28xf32> -> vector<56x28xf32>
    %c0_6 = arith.constant 0 : index
    %c0_7 = arith.constant 0 : index
    %c0_8 = arith.constant 0 : index
    %5 = vector.load %arg3[%c0_6, %c0_7, %c0_8] : memref<3x28x14xf32, #tpu.memory_space<vmem>>, vector<1x28x14xf32>
    %6 = vector.shape_cast %5 : vector<1x28x14xf32> to vector<28x14xf32>
    %cst_9 = arith.constant dense<0.000000e+00> : vector<56x14xf32>
    %7 = tpu.matmul %4, %6, %cst_9 {dimension_numbers = #tpu.dot_dimension_numbers<[1], [0], [0], [1], [0, 0, 1, 1], [], []>} : vector<56x28xf32>, vector<28x14xf32>, vector<56x14xf32> -> vector<56x14xf32>
    %c1 = arith.constant 1 : index
    %c0_10 = arith.constant 0 : index
    %c0_11 = arith.constant 0 : index
    %8 = vector.load %arg2[%c1, %c0_10, %c0_11] : memref<3x56x28xf32, #tpu.memory_space<vmem>>, vector<1x56x28xf32>
    %9 = vector.shape_cast %8 : vector<1x56x28xf32> to vector<56x28xf32>
    %cst_12 = arith.constant dense<0.000000e+00> : vector<56x28xf32>
    %10 = tpu.matmul %9, %1, %cst_12 {dimension_numbers = #tpu.dot_dimension_numbers<[1], [0], [0], [1], [0, 0, 1, 1], [], []>} : vector<56x28xf32>, vector<28x28xf32>, vector<56x28xf32> -> vector<56x28xf32>
    %c1_13 = arith.constant 1 : index
    %c0_14 = arith.constant 0 : index
    %c0_15 = arith.constant 0 : index
    %11 = vector.load %arg3[%c1_13, %c0_14, %c0_15] : memref<3x28x14xf32, #tpu.memory_space<vmem>>, vector<1x28x14xf32>
    %12 = vector.shape_cast %11 : vector<1x28x14xf32> to vector<28x14xf32>
    %cst_16 = arith.constant dense<0.000000e+00> : vector<56x14xf32>
    %13 = tpu.matmul %10, %12, %cst_16 {dimension_numbers = #tpu.dot_dimension_numbers<[1], [0], [0], [1], [0, 0, 1, 1], [], []>} : vector<56x28xf32>, vector<28x14xf32>, vector<56x14xf32> -> vector<56x14xf32>
    %14 = arith.addf %7, %13 : vector<56x14xf32>
    %c2 = arith.constant 2 : index
    %c0_17 = arith.constant 0 : index
    %c0_18 = arith.constant 0 : index
    %15 = vector.load %arg2[%c2, %c0_17, %c0_18] : memref<3x56x28xf32, #tpu.memory_space<vmem>>, vector<1x56x28xf32>
    %16 = vector.shape_cast %15 : vector<1x56x28xf32> to vector<56x28xf32>
    %cst_19 = arith.constant dense<0.000000e+00> : vector<56x28xf32>
    %17 = tpu.matmul %16, %1, %cst_19 {dimension_numbers = #tpu.dot_dimension_numbers<[1], [0], [0], [1], [0, 0, 1, 1], [], []>} : vector<56x28xf32>, vector<28x28xf32>, vector<56x28xf32> -> vector<56x28xf32>
    %c2_20 = arith.constant 2 : index
    %c0_21 = arith.constant 0 : index
    %c0_22 = arith.constant 0 : index
    %18 = vector.load %arg3[%c2_20, %c0_21, %c0_22] : memref<3x28x14xf32, #tpu.memory_space<vmem>>, vector<1x28x14xf32>
    %19 = vector.shape_cast %18 : vector<1x28x14xf32> to vector<28x14xf32>
    %cst_23 = arith.constant dense<0.000000e+00> : vector<56x14xf32>
    %20 = tpu.matmul %17, %19, %cst_23 {dimension_numbers = #tpu.dot_dimension_numbers<[1], [0], [0], [1], [0, 0, 1, 1], [], []>} : vector<56x28xf32>, vector<28x14xf32>, vector<56x14xf32> -> vector<56x14xf32>
    %21 = arith.addf %14, %20 : vector<56x14xf32>
    %c0_24 = arith.constant 0 : index
    %c0_25 = arith.constant 0 : index
    %22 = vector.load %arg4[%c0_24, %c0_25] : memref<56x1xf32, #tpu.memory_space<vmem>>, vector<56x1xf32>
    %23 = vector.broadcast %22 : vector<56x1xf32> to vector<56x14xf32>
    %24 = arith.addf %21, %23 : vector<56x14xf32>
    %cst_26 = arith.constant 0.000000e+00 : f32
    %25 = vector.broadcast %cst_26 : f32 to vector<56x14xf32>
    %26 = arith.maximumf %24, %25 : vector<56x14xf32>
    %c0_27 = arith.constant 0 : index
    %c0_28 = arith.constant 0 : index
    %c0_29 = arith.constant 0 : index
    %27 = vector.load %arg5[%c0_27, %c0_28, %c0_29] : memref<3x56x56xf32, #tpu.memory_space<vmem>>, vector<1x56x56xf32>
    %28 = vector.shape_cast %27 : vector<1x56x56xf32> to vector<56x56xf32>
    %cst_30 = arith.constant dense<0.000000e+00> : vector<56x14xf32>
    %29 = tpu.matmul %28, %26, %cst_30 {dimension_numbers = #tpu.dot_dimension_numbers<[1], [0], [0], [1], [0, 0, 1, 1], [], []>} : vector<56x56xf32>, vector<56x14xf32>, vector<56x14xf32> -> vector<56x14xf32>
    %c0_31 = arith.constant 0 : index
    %c0_32 = arith.constant 0 : index
    %c0_33 = arith.constant 0 : index
    %30 = vector.load %arg6[%c0_31, %c0_32, %c0_33] : memref<3x14x7xf32, #tpu.memory_space<vmem>>, vector<1x14x7xf32>
    %31 = vector.shape_cast %30 : vector<1x14x7xf32> to vector<14x7xf32>
    %cst_34 = arith.constant dense<0.000000e+00> : vector<56x7xf32>
    %32 = tpu.matmul %29, %31, %cst_34 {dimension_numbers = #tpu.dot_dimension_numbers<[1], [0], [0], [1], [0, 0, 1, 1], [], []>} : vector<56x14xf32>, vector<14x7xf32>, vector<56x7xf32> -> vector<56x7xf32>
    %c1_35 = arith.constant 1 : index
    %c0_36 = arith.constant 0 : index
    %c0_37 = arith.constant 0 : index
    %33 = vector.load %arg5[%c1_35, %c0_36, %c0_37] : memref<3x56x56xf32, #tpu.memory_space<vmem>>, vector<1x56x56xf32>
    %34 = vector.shape_cast %33 : vector<1x56x56xf32> to vector<56x56xf32>
    %cst_38 = arith.constant dense<0.000000e+00> : vector<56x14xf32>
    %35 = tpu.matmul %34, %26, %cst_38 {dimension_numbers = #tpu.dot_dimension_numbers<[1], [0], [0], [1], [0, 0, 1, 1], [], []>} : vector<56x56xf32>, vector<56x14xf32>, vector<56x14xf32> -> vector<56x14xf32>
    %c1_39 = arith.constant 1 : index
    %c0_40 = arith.constant 0 : index
    %c0_41 = arith.constant 0 : index
    %36 = vector.load %arg6[%c1_39, %c0_40, %c0_41] : memref<3x14x7xf32, #tpu.memory_space<vmem>>, vector<1x14x7xf32>
    %37 = vector.shape_cast %36 : vector<1x14x7xf32> to vector<14x7xf32>
    %cst_42 = arith.constant dense<0.000000e+00> : vector<56x7xf32>
    %38 = tpu.matmul %35, %37, %cst_42 {dimension_numbers = #tpu.dot_dimension_numbers<[1], [0], [0], [1], [0, 0, 1, 1], [], []>} : vector<56x14xf32>, vector<14x7xf32>, vector<56x7xf32> -> vector<56x7xf32>
    %39 = arith.addf %32, %38 : vector<56x7xf32>
    %c2_43 = arith.constant 2 : index
    %c0_44 = arith.constant 0 : index
    %c0_45 = arith.constant 0 : index
    %40 = vector.load %arg5[%c2_43, %c0_44, %c0_45] : memref<3x56x56xf32, #tpu.memory_space<vmem>>, vector<1x56x56xf32>
    %41 = vector.shape_cast %40 : vector<1x56x56xf32> to vector<56x56xf32>
    %cst_46 = arith.constant dense<0.000000e+00> : vector<56x14xf32>
    %42 = tpu.matmul %41, %26, %cst_46 {dimension_numbers = #tpu.dot_dimension_numbers<[1], [0], [0], [1], [0, 0, 1, 1], [], []>} : vector<56x56xf32>, vector<56x14xf32>, vector<56x14xf32> -> vector<56x14xf32>
    %c2_47 = arith.constant 2 : index
    %c0_48 = arith.constant 0 : index
    %c0_49 = arith.constant 0 : index
    %43 = vector.load %arg6[%c2_47, %c0_48, %c0_49] : memref<3x14x7xf32, #tpu.memory_space<vmem>>, vector<1x14x7xf32>
    %44 = vector.shape_cast %43 : vector<1x14x7xf32> to vector<14x7xf32>
    %cst_50 = arith.constant dense<0.000000e+00> : vector<56x7xf32>
    %45 = tpu.matmul %42, %44, %cst_50 {dimension_numbers = #tpu.dot_dimension_numbers<[1], [0], [0], [1], [0, 0, 1, 1], [], []>} : vector<56x14xf32>, vector<14x7xf32>, vector<56x7xf32> -> vector<56x7xf32>
    %46 = arith.addf %39, %45 : vector<56x7xf32>
    %c0_51 = arith.constant 0 : index
    %c0_52 = arith.constant 0 : index
    %47 = vector.load %arg7[%c0_51, %c0_52] : memref<56x1xf32, #tpu.memory_space<vmem>>, vector<56x1xf32>
    %48 = vector.broadcast %47 : vector<56x1xf32> to vector<56x7xf32>
    %49 = arith.addf %46, %48 : vector<56x7xf32>
    %cst_53 = arith.constant 0.000000e+00 : f32
    %50 = vector.broadcast %cst_53 : f32 to vector<56x7xf32>
    %51 = arith.maximumf %49, %50 : vector<56x7xf32>
    %c0_54 = arith.constant 0 : index
    %c0_55 = arith.constant 0 : index
    %c0_56 = arith.constant 0 : index
    %52 = vector.load %arg8[%c0_54, %c0_55, %c0_56] : memref<3x56x56xf32, #tpu.memory_space<vmem>>, vector<1x56x56xf32>
    %53 = vector.shape_cast %52 : vector<1x56x56xf32> to vector<56x56xf32>
    %cst_57 = arith.constant dense<0.000000e+00> : vector<56x7xf32>
    %54 = tpu.matmul %53, %51, %cst_57 {dimension_numbers = #tpu.dot_dimension_numbers<[1], [0], [0], [1], [0, 0, 1, 1], [], []>} : vector<56x56xf32>, vector<56x7xf32>, vector<56x7xf32> -> vector<56x7xf32>
    %c0_58 = arith.constant 0 : index
    %c0_59 = arith.constant 0 : index
    %c0_60 = arith.constant 0 : index
    %55 = vector.load %arg9[%c0_58, %c0_59, %c0_60] : memref<3x7x14xf32, #tpu.memory_space<vmem>>, vector<1x7x14xf32>
    %56 = vector.shape_cast %55 : vector<1x7x14xf32> to vector<7x14xf32>
    %cst_61 = arith.constant dense<0.000000e+00> : vector<56x14xf32>
    %57 = tpu.matmul %54, %56, %cst_61 {dimension_numbers = #tpu.dot_dimension_numbers<[1], [0], [0], [1], [0, 0, 1, 1], [], []>} : vector<56x7xf32>, vector<7x14xf32>, vector<56x14xf32> -> vector<56x14xf32>
    %c1_62 = arith.constant 1 : index
    %c0_63 = arith.constant 0 : index
    %c0_64 = arith.constant 0 : index
    %58 = vector.load %arg8[%c1_62, %c0_63, %c0_64] : memref<3x56x56xf32, #tpu.memory_space<vmem>>, vector<1x56x56xf32>
    %59 = vector.shape_cast %58 : vector<1x56x56xf32> to vector<56x56xf32>
    %cst_65 = arith.constant dense<0.000000e+00> : vector<56x7xf32>
    %60 = tpu.matmul %59, %51, %cst_65 {dimension_numbers = #tpu.dot_dimension_numbers<[1], [0], [0], [1], [0, 0, 1, 1], [], []>} : vector<56x56xf32>, vector<56x7xf32>, vector<56x7xf32> -> vector<56x7xf32>
    %c1_66 = arith.constant 1 : index
    %c0_67 = arith.constant 0 : index
    %c0_68 = arith.constant 0 : index
    %61 = vector.load %arg9[%c1_66, %c0_67, %c0_68] : memref<3x7x14xf32, #tpu.memory_space<vmem>>, vector<1x7x14xf32>
    %62 = vector.shape_cast %61 : vector<1x7x14xf32> to vector<7x14xf32>
    %cst_69 = arith.constant dense<0.000000e+00> : vector<56x14xf32>
    %63 = tpu.matmul %60, %62, %cst_69 {dimension_numbers = #tpu.dot_dimension_numbers<[1], [0], [0], [1], [0, 0, 1, 1], [], []>} : vector<56x7xf32>, vector<7x14xf32>, vector<56x14xf32> -> vector<56x14xf32>
    %64 = arith.addf %57, %63 : vector<56x14xf32>
    %c2_70 = arith.constant 2 : index
    %c0_71 = arith.constant 0 : index
    %c0_72 = arith.constant 0 : index
    %65 = vector.load %arg8[%c2_70, %c0_71, %c0_72] : memref<3x56x56xf32, #tpu.memory_space<vmem>>, vector<1x56x56xf32>
    %66 = vector.shape_cast %65 : vector<1x56x56xf32> to vector<56x56xf32>
    %cst_73 = arith.constant dense<0.000000e+00> : vector<56x7xf32>
    %67 = tpu.matmul %66, %51, %cst_73 {dimension_numbers = #tpu.dot_dimension_numbers<[1], [0], [0], [1], [0, 0, 1, 1], [], []>} : vector<56x56xf32>, vector<56x7xf32>, vector<56x7xf32> -> vector<56x7xf32>
    %c2_74 = arith.constant 2 : index
    %c0_75 = arith.constant 0 : index
    %c0_76 = arith.constant 0 : index
    %68 = vector.load %arg9[%c2_74, %c0_75, %c0_76] : memref<3x7x14xf32, #tpu.memory_space<vmem>>, vector<1x7x14xf32>
    %69 = vector.shape_cast %68 : vector<1x7x14xf32> to vector<7x14xf32>
    %cst_77 = arith.constant dense<0.000000e+00> : vector<56x14xf32>
    %70 = tpu.matmul %67, %69, %cst_77 {dimension_numbers = #tpu.dot_dimension_numbers<[1], [0], [0], [1], [0, 0, 1, 1], [], []>} : vector<56x7xf32>, vector<7x14xf32>, vector<56x14xf32> -> vector<56x14xf32>
    %71 = arith.addf %64, %70 : vector<56x14xf32>
    %c0_78 = arith.constant 0 : index
    %c0_79 = arith.constant 0 : index
    %72 = vector.load %arg10[%c0_78, %c0_79] : memref<56x1xf32, #tpu.memory_space<vmem>>, vector<56x1xf32>
    %73 = vector.broadcast %72 : vector<56x1xf32> to vector<56x14xf32>
    %74 = arith.addf %71, %73 : vector<56x14xf32>
    %cst_80 = arith.constant 0.000000e+00 : f32
    %75 = vector.broadcast %cst_80 : f32 to vector<56x14xf32>
    %76 = arith.maximumf %74, %75 : vector<56x14xf32>
    %c0_81 = arith.constant 0 : index
    %c0_82 = arith.constant 0 : index
    %c0_83 = arith.constant 0 : index
    %77 = vector.load %arg11[%c0_81, %c0_82, %c0_83] : memref<3x27x56xf32, #tpu.memory_space<vmem>>, vector<1x27x56xf32>
    %78 = vector.shape_cast %77 : vector<1x27x56xf32> to vector<27x56xf32>
    %cst_84 = arith.constant dense<0.000000e+00> : vector<27x14xf32>
    %79 = tpu.matmul %78, %76, %cst_84 {dimension_numbers = #tpu.dot_dimension_numbers<[1], [0], [0], [1], [0, 0, 1, 1], [], []>} : vector<27x56xf32>, vector<56x14xf32>, vector<27x14xf32> -> vector<27x14xf32>
    %c0_85 = arith.constant 0 : index
    %c0_86 = arith.constant 0 : index
    %c0_87 = arith.constant 0 : index
    %80 = vector.load %arg12[%c0_85, %c0_86, %c0_87] : memref<3x14x27xf32, #tpu.memory_space<vmem>>, vector<1x14x27xf32>
    %81 = vector.shape_cast %80 : vector<1x14x27xf32> to vector<14x27xf32>
    %cst_88 = arith.constant dense<0.000000e+00> : vector<27x27xf32>
    %82 = tpu.matmul %79, %81, %cst_88 {dimension_numbers = #tpu.dot_dimension_numbers<[1], [0], [0], [1], [0, 0, 1, 1], [], []>} : vector<27x14xf32>, vector<14x27xf32>, vector<27x27xf32> -> vector<27x27xf32>
    %c1_89 = arith.constant 1 : index
    %c0_90 = arith.constant 0 : index
    %c0_91 = arith.constant 0 : index
    %83 = vector.load %arg11[%c1_89, %c0_90, %c0_91] : memref<3x27x56xf32, #tpu.memory_space<vmem>>, vector<1x27x56xf32>
    %84 = vector.shape_cast %83 : vector<1x27x56xf32> to vector<27x56xf32>
    %cst_92 = arith.constant dense<0.000000e+00> : vector<27x14xf32>
    %85 = tpu.matmul %84, %76, %cst_92 {dimension_numbers = #tpu.dot_dimension_numbers<[1], [0], [0], [1], [0, 0, 1, 1], [], []>} : vector<27x56xf32>, vector<56x14xf32>, vector<27x14xf32> -> vector<27x14xf32>
    %c1_93 = arith.constant 1 : index
    %c0_94 = arith.constant 0 : index
    %c0_95 = arith.constant 0 : index
    %86 = vector.load %arg12[%c1_93, %c0_94, %c0_95] : memref<3x14x27xf32, #tpu.memory_space<vmem>>, vector<1x14x27xf32>
    %87 = vector.shape_cast %86 : vector<1x14x27xf32> to vector<14x27xf32>
    %cst_96 = arith.constant dense<0.000000e+00> : vector<27x27xf32>
    %88 = tpu.matmul %85, %87, %cst_96 {dimension_numbers = #tpu.dot_dimension_numbers<[1], [0], [0], [1], [0, 0, 1, 1], [], []>} : vector<27x14xf32>, vector<14x27xf32>, vector<27x27xf32> -> vector<27x27xf32>
    %89 = arith.addf %82, %88 : vector<27x27xf32>
    %c2_97 = arith.constant 2 : index
    %c0_98 = arith.constant 0 : index
    %c0_99 = arith.constant 0 : index
    %90 = vector.load %arg11[%c2_97, %c0_98, %c0_99] : memref<3x27x56xf32, #tpu.memory_space<vmem>>, vector<1x27x56xf32>
    %91 = vector.shape_cast %90 : vector<1x27x56xf32> to vector<27x56xf32>
    %cst_100 = arith.constant dense<0.000000e+00> : vector<27x14xf32>
    %92 = tpu.matmul %91, %76, %cst_100 {dimension_numbers = #tpu.dot_dimension_numbers<[1], [0], [0], [1], [0, 0, 1, 1], [], []>} : vector<27x56xf32>, vector<56x14xf32>, vector<27x14xf32> -> vector<27x14xf32>
    %c2_101 = arith.constant 2 : index
    %c0_102 = arith.constant 0 : index
    %c0_103 = arith.constant 0 : index
    %93 = vector.load %arg12[%c2_101, %c0_102, %c0_103] : memref<3x14x27xf32, #tpu.memory_space<vmem>>, vector<1x14x27xf32>
    %94 = vector.shape_cast %93 : vector<1x14x27xf32> to vector<14x27xf32>
    %cst_104 = arith.constant dense<0.000000e+00> : vector<27x27xf32>
    %95 = tpu.matmul %92, %94, %cst_104 {dimension_numbers = #tpu.dot_dimension_numbers<[1], [0], [0], [1], [0, 0, 1, 1], [], []>} : vector<27x14xf32>, vector<14x27xf32>, vector<27x27xf32> -> vector<27x27xf32>
    %96 = arith.addf %89, %95 : vector<27x27xf32>
    %c0_105 = arith.constant 0 : index
    %c0_106 = arith.constant 0 : index
    %97 = vector.load %arg13[%c0_105, %c0_106] : memref<27x1xf32, #tpu.memory_space<vmem>>, vector<27x1xf32>
    %98 = vector.broadcast %97 : vector<27x1xf32> to vector<27x27xf32>
    %99 = arith.addf %96, %98 : vector<27x27xf32>
    %cst_107 = arith.constant 0.000000e+00 : f32
    %100 = vector.broadcast %cst_107 : f32 to vector<27x27xf32>
    %101 = arith.maximumf %99, %100 : vector<27x27xf32>
    %102 = math.tanh %101 : vector<27x27xf32>
    %c0_108 = arith.constant 0 : index
    %c0_109 = arith.constant 0 : index
    %c0_110 = arith.constant 0 : index
    %c0_111 = arith.constant 0 : index
    %103 = vector.load %arg14[%c0_108, %c0_109, %c0_110, %c0_111] : memref<1x1x27x27xf32, #tpu.memory_space<vmem>>, vector<1x1x27x27xf32>
    %104 = vector.shape_cast %103 : vector<1x1x27x27xf32> to vector<27x27xf32>
    %105 = vector.shape_cast %102 : vector<27x27xf32> to vector<1x1x27x27xf32>
    tpu.vector_store %arg14[%c0_108, %c0_109, %c0_110, %c0_111], %105 {strides = array<i32>} : memref<1x1x27x27xf32, #tpu.memory_space<vmem>>, vector<1x1x27x27xf32>,
    return
  }
  func.func @transform_0(%arg0: i32) -> (i32, i32, i32, i32) {
    %c0_i32 = arith.constant 0 : i32
    %c0_i32_0 = arith.constant 0 : i32
    %c0_i32_1 = arith.constant 0 : i32
    %c0_i32_2 = arith.constant 0 : i32
    return %arg0, %c0_i32, %c0_i32_0, %c0_i32_1 : i32, i32, i32, i32
  }
  func.func @transform_1(%arg0: i32) -> (i32, i32, i32) {
    %c0_i32 = arith.constant 0 : i32
    %c0_i32_0 = arith.constant 0 : i32
    %c0_i32_1 = arith.constant 0 : i32
    %c0_i32_2 = arith.constant 0 : i32
    return %c0_i32, %c0_i32_0, %c0_i32_1 : i32, i32, i32
  }
  func.func @transform_2(%arg0: i32) -> (i32, i32, i32) {
    %c0_i32 = arith.constant 0 : i32
    %c0_i32_0 = arith.constant 0 : i32
    %c0_i32_1 = arith.constant 0 : i32
    %c0_i32_2 = arith.constant 0 : i32
    return %c0_i32, %c0_i32_0, %c0_i32_1 : i32, i32, i32
  }
  func.func @transform_3(%arg0: i32) -> (i32, i32) {
    %c0_i32 = arith.constant 0 : i32
    %c0_i32_0 = arith.constant 0 : i32
    %c0_i32_1 = arith.constant 0 : i32
    return %c0_i32, %c0_i32_0 : i32, i32
  }
  func.func @transform_4(%arg0: i32) -> (i32, i32, i32) {
    %c0_i32 = arith.constant 0 : i32
    %c0_i32_0 = arith.constant 0 : i32
    %c0_i32_1 = arith.constant 0 : i32
    %c0_i32_2 = arith.constant 0 : i32
    return %c0_i32, %c0_i32_0, %c0_i32_1 : i32, i32, i32
  }
  func.func @transform_5(%arg0: i32) -> (i32, i32, i32) {
    %c0_i32 = arith.constant 0 : i32
    %c0_i32_0 = arith.constant 0 : i32
    %c0_i32_1 = arith.constant 0 : i32
    %c0_i32_2 = arith.constant 0 : i32
    return %c0_i32, %c0_i32_0, %c0_i32_1 : i32, i32, i32
  }
  func.func @transform_6(%arg0: i32) -> (i32, i32) {
    %c0_i32 = arith.constant 0 : i32
    %c0_i32_0 = arith.constant 0 : i32
    %c0_i32_1 = arith.constant 0 : i32
    return %c0_i32, %c0_i32_0 : i32, i32
  }
  func.func @transform_7(%arg0: i32) -> (i32, i32, i32) {
    %c0_i32 = arith.constant 0 : i32
    %c0_i32_0 = arith.constant 0 : i32
    %c0_i32_1 = arith.constant 0 : i32
    %c0_i32_2 = arith.constant 0 : i32
    return %c0_i32, %c0_i32_0, %c0_i32_1 : i32, i32, i32
  }
  func.func @transform_8(%arg0: i32) -> (i32, i32, i32) {
    %c0_i32 = arith.constant 0 : i32
    %c0_i32_0 = arith.constant 0 : i32
    %c0_i32_1 = arith.constant 0 : i32
    %c0_i32_2 = arith.constant 0 : i32
    return %c0_i32, %c0_i32_0, %c0_i32_1 : i32, i32, i32
  }
  func.func @transform_9(%arg0: i32) -> (i32, i32) {
    %c0_i32 = arith.constant 0 : i32
    %c0_i32_0 = arith.constant 0 : i32
    %c0_i32_1 = arith.constant 0 : i32
    return %c0_i32, %c0_i32_0 : i32, i32
  }
  func.func @transform_10(%arg0: i32) -> (i32, i32, i32) {
    %c0_i32 = arith.constant 0 : i32
    %c0_i32_0 = arith.constant 0 : i32
    %c0_i32_1 = arith.constant 0 : i32
    %c0_i32_2 = arith.constant 0 : i32
    return %c0_i32, %c0_i32_0, %c0_i32_1 : i32, i32, i32
  }
  func.func @transform_11(%arg0: i32) -> (i32, i32, i32) {
    %c0_i32 = arith.constant 0 : i32
    %c0_i32_0 = arith.constant 0 : i32
    %c0_i32_1 = arith.constant 0 : i32
    %c0_i32_2 = arith.constant 0 : i32
    return %c0_i32, %c0_i32_0, %c0_i32_1 : i32, i32, i32
  }
  func.func @transform_12(%arg0: i32) -> (i32, i32) {
    %c0_i32 = arith.constant 0 : i32
    %c0_i32_0 = arith.constant 0 : i32
    %c0_i32_1 = arith.constant 0 : i32
    return %c0_i32, %c0_i32_0 : i32, i32
  }
  func.func @transform_13(%arg0: i32) -> (i32, i32, i32, i32) {
    %c0_i32 = arith.constant 0 : i32
    %c0_i32_0 = arith.constant 0 : i32
    %c0_i32_1 = arith.constant 0 : i32
    %c0_i32_2 = arith.constant 0 : i32
    return %arg0, %c0_i32, %c0_i32_0, %c0_i32_1 : i32, i32, i32, i32
  }
}

</mosaic_0001>

<bundles_post_ra>
// kernel: caep_forward.1
= control target key start
LH: loop header
LB: loop body
LE: loop exit
PB: predicated region body
PF: predicated region fallthrough
CT: control target
= control target key end

     0   :  { %18 = vsyncpa [#allocation3], 0  ;;  %s2627_s25 = smov 0   ;;  %s3148_s0 = inlined_call_operand.vmem [shape: f32[2,1,28,28], index: 0, kind: input, shape index: {}]   ;;  %s3149_s1 = inlined_call_operand.vmem [shape: f32[3,56,28], index: 1, kind: input, shape index: {}]   ;;  %s3150_s2 = inlined_call_operand.vmem [shape: f32[3,28,14], index: 2, kind: input, shape index: {}]   ;;  %s3151_s3 = inlined_call_operand.vmem [shape: f32[56,1], index: 3, kind: input, shape index: {}]   ;;  %s3152_s4 = inlined_call_operand.vmem [shape: f32[3,56,56], index: 4, kind: input, shape index: {}]   ;;  %s3153_s5 = inlined_call_operand.vmem [shape: f32[3,14,7], index: 5, kind: input, shape index: {}]   ;;  %s3154_s6 = inlined_call_operand.vmem [shape: f32[56,1], index: 6, kind: input, shape index: {}]   ;;  %s3155_s7 = inlined_call_operand.hbm [shape: f32[3,56,56], index: 7, kind: input, shape index: {}]   ;;  %s3156_s8 = inlined_call_operand.vmem [shape: f32[3,7,14], index: 8, kind: input, shape index: {}]   ;;  %s3157_s9 = inlined_call_operand.vmem [shape: f32[56,1], index: 9, kind: input, shape index: {}]   ;;  %s3158_s10 = inlined_call_operand.vmem [shape: f32[3,27,56], index: 10, kind: input, shape index: {}]   ;;  %s3159_s11 = inlined_call_operand.vmem [shape: f32[3,14,27], index: 11, kind: input, shape index: {}]   ;;  %s3160_s12 = inlined_call_operand.vmem [shape: f32[27,1], index: 12, kind: input, shape index: {}]   ;;  %s3161_s13 = inlined_call_operand.vmem [shape: f32[2,1,27,27], index: 13, kind: output, shape index: {}]  }
   0x1 LB: > { %s362_s28 = sshll.u32 %s3155_s7, 4  ;;  %s2236_s29 = sadd.s32 4294967295, %s2551_s25   ;;  %s2551_s25 = sphi %s2627_s25, %s24_s25   ;;  %s363_s28 = int_to_ptr.hbm [resolvable:$true] %s362_s28 }
   0x2   : > { %p2238_p0 = scmp.ge.s32.totalorder %s2551_s25, 1  ;;  %p333_p1 = scmp.lt.s32.totalorder %s2551_s25, 3 }
   0x3   : > { %p2486_p2 = scmp.eq.s32.totalorder %s2236_s29, 0  ;;  %s2553_s30 = smov [#allocation2]  }
   0x4   : > { %p334_p3 = pnand %p2238_p0, %p333_p1  ;;  %s364_s14 = sshll.u32 %s2553_s30, 4  ;;  %s365_s14 = int_to_ptr.vmem [resolvable:$true] %s364_s14 }
   0x5   : > { %s2554_s15 = smov 128   ;;  %s2555_s16 = smov 8  }
   0x6   : > { %p2482_p4 = pneg %p334_p3  ;;  %403 = sbr.rel (%p334_p3) target bundleno = 1459 (0x5b3), region = 72 }
   0x8   : > { %p2483_p5 = pnand %p2486_p2, %p2482_p4 }
   0xa   : > { %2485 = dma.hbm_to_vmem [thread:$0]  (!%p2483_p5), %s363_s28, 2688, %s365_s14, [#allocation3], %s2554_s15, %s2554_s15, %s2555_s16  }
   0xb   : > { %2546 = dma.done.wait (%p2486_p2), [#allocation3], 2688  }
   0xc   : > { %2548 = vsyncadd (%p2486_p2), [#allocation3], 4294964608  ;;  %p448_p6 = scmp.lt.s32.totalorder %s2236_s29, 1  ;;  %vm491_vm0 = vcmask 1043456   ;;  %v462_v4 = vld [vmem:[%s3149_s1] sm:$0xff]  ;;  %vm469_vm1 = vcmask 228352  }
   0xd   : > { %v2255_v5 = vld [vmem:[%s3149_s1 + $0x38] sm:$0xff]  ;;  %v463_v6 = vld [vmem:[%s3149_s1 + $0x8] sm:$0xff]  ;;  %v2256_v7 = vld [vmem:[%s3149_s1 + $0x40] sm:$0xff]  ;;  %v2556_v36 = vmov 0   ;;  %vm937_vm2 = vcmask 457728   ;;  %vm1091_vm3 = vcmask 1045504  }
   0xe   : > { %s3163_s29 = smov (!%p448_p6, %s2236_s29), 1  ;;  %v464_v8 = vld [vmem:[%s3149_s1 + $0x10] sm:$0xff]  ;;  %v2257_v9 = vld [vmem:[%s3149_s1 + $0x48] sm:$0xff]  ;;  %v465_v10 = vld [vmem:[%s3149_s1 + $0x18] sm:$0xff]  ;;  %2500 = vset.pattern.permute.xlu0 %v2556_v36  ;;  %2501 = vset.pattern.permute.xlu1 %v2556_v36  ;;  %vm1069_vm4 = vcmask 113664   ;;  %vm1548_vm5 = vcmask 1046528  }
   0xf   : > { %s2468_s17 = sshll.u32 %s3163_s29, 5  ;;  %v2258_v11 = vld [vmem:[%s3149_s1 + $0x50] sm:$0xff]  ;;  %v466_v12 = vld [vmem:[%s3149_s1 + $0x20] sm:$0xff]  ;;  %v2259_v13 = vld [vmem:[%s3149_s1 + $0x58] sm:$0xff]  ;;  %2502 = vset.pattern.permute.xlu2 %v2556_v36  ;;  %vm1526_vm6 = vcmask 56320   ;;  %vm2163_vm7 = vcmask 220160  }
  0x10   : > { %s452_s20 = scalar_lea.vmem %s3148_s0, %s2468_s17  ;;  %v467_v14 = vld [vmem:[%s3149_s1 + $0x28] sm:$0xff]  ;;  %v2260_v15 = vld [vmem:[%s3149_s1 + $0x60] sm:$0xff]  ;;  %v2290_v16 = vld [vmem:[%s3149_s1 + $0x70] sm:$0xff]  ;;  %s3136_s26 = scalar_lea.vmem %s3161_s13, %s2468_s17  ;;  %vm2167_vm8 = vcmask 215040  }
  0x11   : > { %v461_v0 = vld [vmem:[%s452_s20 + $0x18] sm:$0xf]  ;;  %v460_v1 = vld [vmem:[%s452_s20 + $0x10] sm:$0xff]  ;;  %v459_v2 = vld [vmem:[%s452_s20 + $0x8] sm:$0xff] }
  0x12   : > { %2247 = vmatpush.msk.msra.mxu0 %vm491_vm0, %v461_v0  ;;  %2262 = vmatpush.msk.msra.mxu1 %vm491_vm0, %v461_v0  ;;  %v458_v3 = vld [vmem:[%s452_s20] sm:$0xff]  ;;  %v468_v17 = vld [vmem:[%s3149_s1 + $0x30] sm:$0xff]  ;;  %v2261_v18 = vld [vmem:[%s3149_s1 + $0x68] sm:$0xff] }
  0x13   : > { %2470 = vmatpush.msk.msra.mxu2 %vm491_vm0, %v461_v0  ;;  %2474 = vmatpush.msk.msra.mxu3 %vm491_vm0, %v461_v0  ;;  %v2291_v19 = vld [vmem:[%s3149_s1 + $0x78] sm:$0xff]  ;;  %v2292_v20 = vld [vmem:[%s3149_s1 + $0x80] sm:$0xff]  ;;  %v2272_v23 = vld [vmem:[%s3150_s2 + $0x30] sm:$0xff] }
  0x14   : > { %508 = vmatpush.msra.mxu0 %v460_v1  ;;  %579 = vmatpush.msra.mxu1 %v460_v1  ;;  %v2273_v21 = vld [vmem:[%s3150_s2 + $0x38] sm:$0xf]  ;;  %v535_v24 = vld [vmem:[%s3150_s2 + $0x10] sm:$0xff]  ;;  %v2271_v25 = vld [vmem:[%s3150_s2 + $0x28] sm:$0xff] }
  0x15   : > { %2471 = vmatpush.msra.mxu2 %v460_v1  ;;  %2475 = vmatpush.msra.mxu3 %v460_v1  ;;  %v536_v22 = vld [vmem:[%s3150_s2 + $0x18] sm:$0xf]  ;;  %v534_v26 = vld [vmem:[%s3150_s2 + $0x8] sm:$0xff]  ;;  %v2294_v28 = vld [vmem:[%s3149_s1 + $0x90] sm:$0xff] }
  0x16   : > { %509 = vmatpush.msra.mxu0 %v459_v2  ;;  %580 = vmatpush.msra.mxu1 %v459_v2  ;;  %v2293_v27 = vld [vmem:[%s3149_s1 + $0x88] sm:$0xff]  ;;  %v2295_v29 = vld [vmem:[%s3149_s1 + $0x98] sm:$0xff]  ;;  %v2270_v30 = vld [vmem:[%s3150_s2 + $0x20] sm:$0xff] }
  0x17   : > { %2472 = vmatpush.msra.mxu2 %v459_v2  ;;  %2476 = vmatpush.msra.mxu3 %v459_v2  ;;  %v533_v31 = vld [vmem:[%s3150_s2] sm:$0xff]  ;;  %v880_v35 = vld [vmem:[%s3151_s3 + $0x30] sm:$0xff]  ;;  %v2308_v39 = vld [vmem:[%s3150_s2 + $0x58] sm:$0xf] }
  0x18   : > { %510 = vmatpush.msra.mxu0 %v458_v3  ;;  %581 = vmatpush.msra.mxu1 %v458_v3  ;;  %v2296_v32 = vld [vmem:[%s3149_s1 + $0xa0] sm:$0xff]  ;;  %v2307_v40 = vld [vmem:[%s3150_s2 + $0x50] sm:$0xff]  ;;  %v879_v41 = vld [vmem:[%s3151_s3 + $0x28] sm:$0xff] }
  0x19   : > { %2248 = vmatmul.msk.f32.vlgmr.msra.gmra.mxu0 %vm469_vm1, %v462_v4  ;;  %2263 = vmatmul.msk.f32.vlgmr.msra.gmra.mxu1 %vm469_vm1, %v2255_v5  ;;  %v2306_v42 = vld [vmem:[%s3150_s2 + $0x48] sm:$0xff]  ;;  %v2305_v43 = vld [vmem:[%s3150_s2 + $0x40] sm:$0xff]  ;;  %v877_v50 = vld [vmem:[%s3151_s3 + $0x18] sm:$0xff] }
  0x1a   : > { %2297 = vmatpush.msk.msrb.mxu0 %vm491_vm0, %v461_v0  ;;  %2473 = vmatpush.msra.mxu2 %v458_v3  ;;  %v878_v46 = vld [vmem:[%s3151_s3 + $0x20] sm:$0xff]  ;;  %v1340_v54 = vld [vmem:[%s3154_s6 + $0x30] sm:$0xff]  ;;  %v1335_v55 = vld [vmem:[%s3154_s6 + $0x8] sm:$0xff] }
  0x1b   : > { %2477 = vmatpush.msra.mxu3 %v458_v3  ;;  %2254 = vmatmul.msk.f32.vlgmr.msra.gmra.mxu2 %vm469_vm1, %v468_v17  ;;  %v874_v47 = vld [vmem:[%s3151_s3] sm:$0xff]  ;;  %v1337_v58 = vld [vmem:[%s3154_s6 + $0x18] sm:$0xff]  ;;  %v876_v59 = vld [vmem:[%s3151_s3 + $0x10] sm:$0xff] }
  0x1c   : > { %775 = vmatpush.msrb.mxu0 %v460_v1  ;;  %2269 = vmatmul.msk.f32.vlgmr.msra.gmra.mxu3 %vm469_vm1, %v2261_v18  ;;  %v1338_v51 = vld [vmem:[%s3154_s6 + $0x20] sm:$0xff]  ;;  %v1795_v60 = vld [vmem:[%s3157_s9 + $0x28] sm:$0xff]  ;;  %v1792_v0 = vld [vmem:[%s3157_s9 + $0x10] sm:$0xff] }
  0x1d   : > { %2274 = vmatpush.msk.msrb.mxu2 %vm491_vm0, %v2273_v21  ;;  %2282 = vmatpush.msk.msrb.mxu3 %vm491_vm0, %v536_v22  ;;  %v1334_v62 = vld [vmem:[%s3154_s6] sm:$0xff]  ;;  %v875_v63 = vld [vmem:[%s3151_s3 + $0x8] sm:$0xff] }
  0x1e   : > { %776 = vmatpush.msrb.mxu0 %v459_v2  ;;  %913 = vperm.xlu0 %2500, %v880_v35   ;;  %v1794_v4 = vld [vmem:[%s3157_s9 + $0x20] sm:$0xff]  ;;  %v1339_v5 = vld [vmem:[%s3154_s6 + $0x28] sm:$0xff] }
  0x1f   : > { %646 = vmatpush.msrb.mxu2 %v2272_v23  ;;  %708 = vmatpush.msrb.mxu3 %v535_v24 }
  0x20   : > { %777 = vmatpush.msrb.mxu0 %v458_v3  ;;  %2309 = vmatpush.msk.msrb.mxu1 %vm491_vm0, %v2308_v39 }
  0x21   : > { %2249 = vmatmul.msk.f32.gmra.mxu0 %vm469_vm1, %v463_v6  ;;  %2264 = vmatmul.msk.f32.gmra.mxu1 %vm469_vm1, %v2256_v7  ;;  %v2127_v6 = vld [vmem:[%s3160_s12] sm:$0xff] }
  0x22   : > { %647 = vmatpush.msrb.mxu2 %v2271_v25  ;;  %709 = vmatpush.msrb.mxu3 %v534_v26 }
  0x23   : > { %842 = vmatpush.msrb.mxu1 %v2307_v40  ;;  %903 = vperm.xlu1 %2501, %v878_v46  }
  0x24   : > { %648 = vmatpush.msrb.mxu2 %v2270_v30  ;;  %710 = vmatpush.msrb.mxu3 %v533_v31 }
  0x25   : > { %843 = vmatpush.msrb.mxu1 %v2306_v42  ;;  %893 = vperm.xlu2 %2502, %v876_v59  }
  0x26   : > { %908 = vperm.xlu0 %2500, %v879_v41  }
  0x27   : > { %844 = vmatpush.msrb.mxu1 %v2305_v43 }
  0x29   : > { %2250 = vmatmul.msk.f32.gmra.mxu0 %vm469_vm1, %v464_v8  ;;  %2265 = vmatmul.msk.f32.gmra.mxu1 %vm469_vm1, %v2257_v9  ;;  %v1791_v8 = vld [vmem:[%s3157_s9 + $0x8] sm:$0xff]  ;;  %v1336_v9 = vld [vmem:[%s3154_s6 + $0x10] sm:$0xff] }
  0x2b   : > { %898 = vperm.xlu1 %2501, %v877_v50  }
  0x2d   : > { %888 = vperm.xlu2 %2502, %v875_v63  }
  0x2e   : > { %883 = vperm.xlu0 %2500, %v874_v47  }
  0x31   : > { %2251 = vmatmul.msk.f32.gmra.mxu0 %vm469_vm1, %v465_v10  ;;  %2266 = vmatmul.msk.f32.gmra.mxu1 %vm469_vm1, %v2258_v11  ;;  %v2130_v10 = vld [vmem:[%s3160_s12 + $0x18] sm:$0x7]  ;;  %v2128_v11 = vld [vmem:[%s3160_s12 + $0x8] sm:$0xff] }
  0x33   : > { %1373 = vperm.xlu1 %2501, %v1340_v54  }
  0x35   : > { %1368 = vperm.xlu2 %2502, %v1339_v5  }
  0x36   : > { %1363 = vperm.xlu0 %2500, %v1338_v51  }
  0x39   : > { %2252 = vmatmul.msk.f32.gmra.mxu0 %vm469_vm1, %v466_v12  ;;  %2267 = vmatmul.msk.f32.gmra.mxu1 %vm469_vm1, %v2259_v13  ;;  %v1796_v12 = vld [vmem:[%s3157_s9 + $0x30] sm:$0xff] }
  0x3b   : > { %1358 = vperm.xlu1 %2501, %v1337_v58  }
  0x3d   : > { %1353 = vperm.xlu2 %2502, %v1336_v9  }
  0x3e   : > { %1348 = vperm.xlu0 %2500, %v1335_v55  }
  0x41   : > { %2253 = vmatmul.msk.f32.gmra.mxu0 %vm469_vm1, %v467_v14  ;;  %2268 = vmatmul.msk.f32.gmra.mxu1 %vm469_vm1, %v2260_v15  ;;  %v1793_v14 = vld [vmem:[%s3157_s9 + $0x18] sm:$0xff] }
  0x43   : > { %1343 = vperm.xlu1 %2501, %v1334_v62  }
  0x45   : > { %1829 = vperm.xlu2 %2502, %v1796_v12   ;;  %v930_v12 = vld [vmem:[%s3152_s4] sm:$0xff] }
  0x46   : > { %1824 = vperm.xlu0 %2500, %v1795_v60  }
  0x49   : > { %2298 = vmatmul.msk.f32.vlgmr.msrb.gmra.mxu0 %vm469_vm1, %v2290_v16  ;;  %v1790_v16 = vld [vmem:[%s3157_s9] sm:$0xff] }
  0x4b   : > { %1819 = vperm.xlu1 %2501, %v1794_v4  }
  0x4d   : > { %1814 = vperm.xlu2 %2502, %v1793_v14   ;;  %v931_v14 = vld [vmem:[%s3152_s4 + $0x8] sm:$0xff] }
  0x4e   : > { %1809 = vperm.xlu0 %2500, %v1792_v0  }
  0x51   : > { %2299 = vmatmul.msk.f32.gmra.mxu0 %vm469_vm1, %v2291_v19  ;;  %v2129_v19 = vld [vmem:[%s3160_s12 + $0x10] sm:$0xff] }
  0x53   : > { %1804 = vperm.xlu1 %2501, %v1791_v8  }
  0x55   : > { %1799 = vperm.xlu2 %2502, %v1790_v16   ;;  %v932_v16 = vld [vmem:[%s3152_s4 + $0x10] sm:$0xff] }
  0x56   : > { %2133 = vperm.xlu0 %2500, %v2127_v6  }
  0x59   : > { %2300 = vmatmul.msk.f32.gmra.mxu0 %vm469_vm1, %v2292_v20 }
  0x5b   : > { %2138 = vperm.xlu1 %2501, %v2128_v11  }
  0x5d   : > { %2143 = vperm.xlu2 %2502, %v2129_v19   ;;  %v2327_v19 = vld [vmem:[%s3152_s4 + $0x50] sm:$0xff] }
  0x5e   : > { %2148 = vperm.xlu0 %2500, %v2130_v10  }
  0x61   : > { %2301 = vmatmul.msk.f32.gmra.mxu0 %vm469_vm1, %v2293_v27 }
  0x69   : > { %2302 = vmatmul.msk.f32.gmra.mxu0 %vm469_vm1, %v2294_v28 }
  0x71   : > { %2303 = vmatmul.msk.f32.gmra.mxu0 %vm469_vm1, %v2295_v29 }
  0x79   : > { %2304 = vmatmul.msk.f32.gmra.mxu0 %vm469_vm1, %v2296_v32 }
  0x7f   : > { %v894_v46 = vpop.permute.xlu2 %893 }
  0x87   : > { %v889_v4 = vpop.permute.xlu2 %888 }
  0x95   : > { %v904_v41 = vpop.permute.xlu1 %903 }
  0x96   : > { %v512_v33 = vpop.f32.mrf.mxu0  ;;  %v583_v34 = vpop.f32.mrf.mxu1 }
  0x97   : > { %2275 = vmatmul.msk.f32.vlgmr.msrb.gmra.mxu2 %vm469_vm1, %v583_v34  ;;  %2283 = vmatmul.msk.f32.vlgmr.msrb.gmra.mxu3 %vm469_vm1, %v512_v33 }
  0x9d   : > { %v899_v60 = vpop.permute.xlu1 %898 }
  0x9e   : > { %v515_v37 = vpop.f32.mrf.mxu0  ;;  %v586_v38 = vpop.f32.mrf.mxu1 }
  0x9f   : > { %2276 = vmatmul.msk.f32.gmra.mxu2 %vm469_vm1, %v586_v38  ;;  %2284 = vmatmul.msk.f32.gmra.mxu3 %vm469_vm1, %v515_v37  ;;  %v530_v1 = vpop.f32.mrf.mxu2  ;;  %v601_v2 = vpop.f32.mrf.mxu3 }
  0xa0   : > { %v914_v37 = vpop.permute.xlu0 %913 }
  0xa6   : > { %v518_v44 = vpop.f32.mrf.mxu0  ;;  %v589_v45 = vpop.f32.mrf.mxu1 }
  0xa7   : > { %2277 = vmatmul.msk.f32.gmra.mxu2 %vm469_vm1, %v589_v45  ;;  %2285 = vmatmul.msk.f32.gmra.mxu3 %vm469_vm1, %v518_v44 }
  0xa8   : > { %v909_v51 = vpop.permute.xlu0 %908 }
  0xae   : > { %v521_v48 = vpop.f32.mrf.mxu0  ;;  %v592_v49 = vpop.f32.mrf.mxu1 }
  0xaf   : > { %2278 = vmatmul.msk.f32.gmra.mxu2 %vm469_vm1, %v592_v49  ;;  %2286 = vmatmul.msk.f32.gmra.mxu3 %vm469_vm1, %v521_v48 }
  0xb6   : > { %v524_v52 = vpop.f32.mrf.mxu0  ;;  %v595_v53 = vpop.f32.mrf.mxu1 }
  0xb7   : > { %2279 = vmatmul.msk.f32.gmra.mxu2 %vm469_vm1, %v595_v53  ;;  %2287 = vmatmul.msk.f32.gmra.mxu3 %vm469_vm1, %v524_v52 }
  0xbe   : > { %v527_v56 = vpop.f32.mrf.mxu0  ;;  %v598_v57 = vpop.f32.mrf.mxu1 }
  0xbf   : > { %2280 = vmatmul.msk.f32.gmra.mxu2 %vm469_vm1, %v598_v57  ;;  %2288 = vmatmul.msk.f32.gmra.mxu3 %vm469_vm1, %v527_v56 }
  0xc6   : > { %v779_v61 = vpop.f32.mrf.mxu0 }
  0xc7   : > { %2310 = vmatmul.msk.f32.vlgmr.msrb.gmra.mxu1 %vm469_vm1, %v779_v61  ;;  %2281 = vmatmul.msk.f32.gmra.mxu2 %vm469_vm1, %v601_v2 }
  0xc8   : > { %2289 = vmatmul.msk.f32.gmra.mxu3 %vm469_vm1, %v530_v1 }
  0xce   : > { %v782_v3 = vpop.f32.mrf.mxu0 }
  0xcf   : > { %2311 = vmatmul.msk.f32.gmra.mxu1 %vm469_vm1, %v782_v3 }
  0xd6   : > { %v785_v7 = vpop.f32.mrf.mxu0 }
  0xd7   : > { %2312 = vmatmul.msk.f32.gmra.mxu1 %vm469_vm1, %v785_v7  ;;  %v884_v7 = vpop.permute.xlu0 %883 }
  0xde   : > { %v788_v13 = vpop.f32.mrf.mxu0 }
  0xdf   : > { %2313 = vmatmul.msk.f32.gmra.mxu1 %vm469_vm1, %v788_v13  ;;  %v2324_v13 = vld [vmem:[%s3152_s4 + $0x38] sm:$0xff] }
  0xe6   : > { %v791_v15 = vpop.f32.mrf.mxu0 }
  0xe7   : > { %2314 = vmatmul.msk.f32.gmra.mxu1 %vm469_vm1, %v791_v15  ;;  %v2325_v15 = vld [vmem:[%s3152_s4 + $0x40] sm:$0xff] }
  0xee   : > { %v794_v17 = vpop.f32.mrf.mxu0 }
  0xef   : > { %2315 = vmatmul.msk.f32.gmra.mxu1 %vm469_vm1, %v794_v17  ;;  %v2326_v17 = vld [vmem:[%s3152_s4 + $0x48] sm:$0xff] }
  0xf6   : > { %v797_v18 = vpop.f32.mrf.mxu0 }
  0xf7   : > { %2316 = vmatmul.msk.f32.gmra.mxu1 %vm469_vm1, %v797_v18  ;;  %v933_v18 = vld [vmem:[%s3152_s4 + $0x18] sm:$0xff] }
 0x11a   : > { %v650_v20 = vpop.f32.mrf.mxu2  ;;  %v712_v21 = vpop.f32.mrf.mxu3 }
 0x11b   : > { %v713_v61 = vadd.f32 %v712_v21, %v650_v20  ;;  %v934_v20 = vld [vmem:[%s3152_s4 + $0x20] sm:$0xff]  ;;  %v2328_v21 = vld [vmem:[%s3152_s4 + $0x58] sm:$0xff] }
 0x122   : > { %v653_v22 = vpop.f32.mrf.mxu2  ;;  %v715_v23 = vpop.f32.mrf.mxu3 }
 0x123   : > { %v716_v56 = vadd.f32 %v715_v23, %v653_v22  ;;  %v935_v22 = vld [vmem:[%s3152_s4 + $0x28] sm:$0xff]  ;;  %v2329_v23 = vld [vmem:[%s3152_s4 + $0x60] sm:$0xff] }
 0x12a   : > { %v656_v25 = vpop.f32.mrf.mxu2  ;;  %v718_v26 = vpop.f32.mrf.mxu3 }
 0x12b   : > { %v719_v52 = vadd.f32 %v718_v26, %v656_v25  ;;  %v2330_v25 = vld [vmem:[%s3152_s4 + $0x68] sm:$0xff]  ;;  %v2356_v26 = vld [vmem:[%s3152_s4 + $0x70] sm:$0xff] }
 0x132   : > { %v659_v28 = vpop.f32.mrf.mxu2  ;;  %v721_v29 = vpop.f32.mrf.mxu3 }
 0x133   : > { %v722_v48 = vadd.f32 %v721_v29, %v659_v28  ;;  %v2358_v28 = vld [vmem:[%s3152_s4 + $0x80] sm:$0xff]  ;;  %v2339_v29 = vld [vmem:[%s3153_s5 + $0x18] sm:$0x3f] }
 0x134   : > { %2340 = vmatpush.msk.msra.mxu0 %vm1091_vm3, %v2339_v29 }
 0x13a   : > { %v662_v31 = vpop.f32.mrf.mxu2  ;;  %v724_v32 = vpop.f32.mrf.mxu3 }
 0x13b   : > { %v725_v44 = vadd.f32 %v724_v32, %v662_v31  ;;  %v2359_v31 = vld [vmem:[%s3152_s4 + $0x88] sm:$0xff]  ;;  %v2360_v32 = vld [vmem:[%s3152_s4 + $0x90] sm:$0xff] }
 0x142   : > { %v665_v35 = vpop.f32.mrf.mxu2  ;;  %v727_v36 = vpop.f32.mrf.mxu3 }
 0x143   : > { %v728_v42 = vadd.f32 %v727_v36, %v665_v35  ;;  %v997_v35 = vld [vmem:[%s3153_s5] sm:$0xff] }
 0x144   : > { %v846_v24 = vpop.f32.mrf.mxu1  ;;  %v2362_v36 = vld [vmem:[%s3152_s4 + $0xa0] sm:$0xff] }
 0x145   : > { %v867_v1 = vadd.f32 %v846_v24, %v713_v61  ;;  %v936_v24 = vld [vmem:[%s3152_s4 + $0x30] sm:$0xff] }
 0x147   : > { %v916_v8 = vadd.f32 %v884_v7, %v867_v1 }
 0x149   : > { %v923_v11 = vmax.f32 %v916_v8, 0.0 }
 0x14a   : > { %v668_v39 = vpop.f32.mrf.mxu2 }
 0x14b   : > { %v730_v40 = vpop.f32.mrf.mxu3 }
 0x14c   : > { %v849_v27 = vpop.f32.mrf.mxu1  ;;  %v731_v43 = vadd.f32 %v730_v40, %v668_v39 }
 0x14d   : > { %v868_v62 = vadd.f32 %v849_v27, %v716_v56  ;;  %v2357_v27 = vld [vmem:[%s3152_s4 + $0x78] sm:$0xff] }
 0x14f   : > { %v917_v5 = vadd.f32 %v889_v4, %v868_v62 }
 0x151   : > { %v924_v10 = vmax.f32 %v917_v5, 0.0 }
 0x154   : > { %v852_v30 = vpop.f32.mrf.mxu1 }
 0x155   : > { %v869_v57 = vadd.f32 %v852_v30, %v719_v52  ;;  %v998_v30 = vld [vmem:[%s3153_s5 + $0x8] sm:$0x3f] }
 0x156   : > { %2348 = vmatpush.msk.msra.mxu1 %vm1091_vm3, %v998_v30 }
 0x157   : > { %v918_v2 = vadd.f32 %v894_v46, %v869_v57  ;;  %v2370_v46 = vld [vmem:[%s3153_s5 + $0x20] sm:$0xff] }
 0x158   : > { %1172 = vmatpush.msra.mxu1 %v997_v35 }
 0x159   : > { %v925_v9 = vmax.f32 %v918_v2, 0.0 }
 0x15c   : > { %v855_v33 = vpop.f32.mrf.mxu1 }
 0x15d   : > { %v870_v53 = vadd.f32 %v855_v33, %v722_v48  ;;  %v2361_v33 = vld [vmem:[%s3152_s4 + $0x98] sm:$0xff] }
 0x15f   : > { %v919_v63 = vadd.f32 %v899_v60, %v870_v53 }
 0x161   : > { %v926_v6 = vmax.f32 %v919_v63, 0.0 }
 0x164   : > { %v858_v34 = vpop.f32.mrf.mxu1 }
 0x165   : > { %v871_v49 = vadd.f32 %v858_v34, %v725_v44  ;;  %v2338_v34 = vld [vmem:[%s3153_s5 + $0x10] sm:$0xff] }
 0x166   : > { %1110 = vmatpush.msra.mxu0 %v2338_v34 }
 0x167   : > { %v920_v58 = vadd.f32 %v904_v41, %v871_v49  ;;  %v2371_v41 = vld [vmem:[%s3153_s5 + $0x28] sm:$0x3f] }
 0x169   : > { %v927_v3 = vmax.f32 %v920_v58, 0.0 }
 0x16c   : > { %v861_v38 = vpop.f32.mrf.mxu1 }
 0x16d   : > { %v872_v45 = vadd.f32 %v861_v38, %v728_v42 }
 0x16f   : > { %v921_v54 = vadd.f32 %v909_v51, %v872_v45 }
 0x171   : > { %v928_v0 = vmax.f32 %v921_v54, 0.0 }
 0x174   : > { %v864_v47 = vpop.f32.mrf.mxu1 }
 0x175   : > { %v873_v50 = vadd.f32 %v864_v47, %v731_v43 }
 0x177   : > { %v922_v55 = vadd.f32 %v914_v37, %v873_v50 }
 0x179   : > { %v929_v59 = vmax.f32 %v922_v55, 0.0 }
 0x17b   : > { %968 = vmatpush.msra.mxu2 %v929_v59  ;;  %1037 = vmatpush.msra.mxu3 %v929_v59 }
 0x17d   : > { %969 = vmatpush.msra.mxu2 %v928_v0  ;;  %1038 = vmatpush.msra.mxu3 %v928_v0 }
 0x17f   : > { %970 = vmatpush.msra.mxu2 %v927_v3  ;;  %1039 = vmatpush.msra.mxu3 %v927_v3 }
 0x181   : > { %971 = vmatpush.msra.mxu2 %v926_v6  ;;  %1040 = vmatpush.msra.mxu3 %v926_v6 }
 0x183   : > { %972 = vmatpush.msra.mxu2 %v925_v9  ;;  %1041 = vmatpush.msra.mxu3 %v925_v9 }
 0x185   : > { %973 = vmatpush.msra.mxu2 %v924_v10  ;;  %1042 = vmatpush.msra.mxu3 %v924_v10 }
 0x187   : > { %974 = vmatpush.msra.mxu2 %v923_v11  ;;  %1043 = vmatpush.msra.mxu3 %v923_v11 }
 0x188   : > { %2317 = vmatmul.msk.f32.vlgmr.msra.gmra.mxu2 %vm937_vm2, %v930_v12  ;;  %2331 = vmatmul.msk.f32.vlgmr.msra.gmra.mxu3 %vm937_vm2, %v2324_v13  ;;  %v1374_v13 = vpop.permute.xlu1 %1373 }
 0x189   : > { %1233 = vmatpush.msrb.mxu2 %v929_v59  ;;  %2372 = vmatpush.msk.msrb.mxu3 %vm1091_vm3, %v2371_v41 }
 0x18b   : > { %1234 = vmatpush.msrb.mxu2 %v928_v0  ;;  %1304 = vmatpush.msrb.mxu3 %v2370_v46 }
 0x18d   : > { %1235 = vmatpush.msrb.mxu2 %v927_v3 }
 0x18f   : > { %1236 = vmatpush.msrb.mxu2 %v926_v6 }
 0x190   : > { %2318 = vmatmul.msk.f32.gmra.mxu2 %vm937_vm2, %v931_v14  ;;  %2332 = vmatmul.msk.f32.gmra.mxu3 %vm937_vm2, %v2325_v15 }
 0x191   : > { %1237 = vmatpush.msrb.mxu2 %v925_v9 }
 0x193   : > { %1238 = vmatpush.msrb.mxu2 %v924_v10 }
 0x195   : > { %1239 = vmatpush.msrb.mxu2 %v923_v11 }
 0x198   : > { %2319 = vmatmul.msk.f32.gmra.mxu2 %vm937_vm2, %v932_v16  ;;  %2333 = vmatmul.msk.f32.gmra.mxu3 %vm937_vm2, %v2326_v17 }
 0x1a0   : > { %2320 = vmatmul.msk.f32.gmra.mxu2 %vm937_vm2, %v933_v18  ;;  %2334 = vmatmul.msk.f32.gmra.mxu3 %vm937_vm2, %v2327_v19  ;;  %v1369_v18 = vpop.permute.xlu2 %1368 }
 0x1a8   : > { %2321 = vmatmul.msk.f32.gmra.mxu2 %vm937_vm2, %v934_v20  ;;  %2335 = vmatmul.msk.f32.gmra.mxu3 %vm937_vm2, %v2328_v21 }
 0x1b0   : > { %2322 = vmatmul.msk.f32.gmra.mxu2 %vm937_vm2, %v935_v22  ;;  %2336 = vmatmul.msk.f32.gmra.mxu3 %vm937_vm2, %v2329_v23  ;;  %v1364_v22 = vpop.permute.xlu0 %1363 }
 0x1b8   : > { %2323 = vmatmul.msk.f32.gmra.mxu2 %vm937_vm2, %v936_v24  ;;  %2337 = vmatmul.msk.f32.gmra.mxu3 %vm937_vm2, %v2330_v25 }
 0x1c0   : > { %2363 = vmatmul.msk.f32.vlgmr.msrb.gmra.mxu2 %vm937_vm2, %v2356_v26 }
 0x1c8   : > { %2364 = vmatmul.msk.f32.gmra.mxu2 %vm937_vm2, %v2357_v27  ;;  %v1359_v27 = vpop.permute.xlu1 %1358 }
 0x1d0   : > { %2365 = vmatmul.msk.f32.gmra.mxu2 %vm937_vm2, %v2358_v28 }
 0x1d8   : > { %2366 = vmatmul.msk.f32.gmra.mxu2 %vm937_vm2, %v2359_v31 }
 0x1e0   : > { %2367 = vmatmul.msk.f32.gmra.mxu2 %vm937_vm2, %v2360_v32 }
 0x1e8   : > { %2368 = vmatmul.msk.f32.gmra.mxu2 %vm937_vm2, %v2361_v33 }
 0x1f0   : > { %2369 = vmatmul.msk.f32.gmra.mxu2 %vm937_vm2, %v2362_v36 }
 0x20b   : > { %v976_v37 = vpop.f32.mrf.mxu2  ;;  %v1045_v38 = vpop.f32.mrf.mxu3 }
 0x20c   : > { %2341 = vmatmul.msk.f32.vlgmr.msra.gmra.mxu0 %vm1069_vm4, %v1045_v38  ;;  %2349 = vmatmul.msk.f32.vlgmr.msra.gmra.mxu1 %vm1069_vm4, %v976_v37 }
 0x213   : > { %v979_v39 = vpop.f32.mrf.mxu2  ;;  %v1048_v40 = vpop.f32.mrf.mxu3 }
 0x214   : > { %2342 = vmatmul.msk.f32.gmra.mxu0 %vm1069_vm4, %v1048_v40  ;;  %2350 = vmatmul.msk.f32.gmra.mxu1 %vm1069_vm4, %v979_v39  ;;  %v1354_v40 = vpop.permute.xlu2 %1353 }
 0x21b   : > { %v982_v42 = vpop.f32.mrf.mxu2  ;;  %v1051_v43 = vpop.f32.mrf.mxu3 }
 0x21c   : > { %2343 = vmatmul.msk.f32.gmra.mxu0 %vm1069_vm4, %v1051_v43  ;;  %2351 = vmatmul.msk.f32.gmra.mxu1 %vm1069_vm4, %v982_v42 }
 0x223   : > { %v985_v44 = vpop.f32.mrf.mxu2  ;;  %v1054_v45 = vpop.f32.mrf.mxu3 }
 0x224   : > { %2344 = vmatmul.msk.f32.gmra.mxu0 %vm1069_vm4, %v1054_v45  ;;  %2352 = vmatmul.msk.f32.gmra.mxu1 %vm1069_vm4, %v985_v44  ;;  %v1349_v44 = vpop.permute.xlu0 %1348 }
 0x22b   : > { %v988_v47 = vpop.f32.mrf.mxu2  ;;  %v1057_v48 = vpop.f32.mrf.mxu3 }
 0x22c   : > { %2345 = vmatmul.msk.f32.gmra.mxu0 %vm1069_vm4, %v1057_v48  ;;  %2353 = vmatmul.msk.f32.gmra.mxu1 %vm1069_vm4, %v988_v47  ;;  %v1344_v47 = vpop.permute.xlu1 %1343 }
 0x233   : > { %v991_v49 = vpop.f32.mrf.mxu2  ;;  %v1060_v50 = vpop.f32.mrf.mxu3 }
 0x234   : > { %2346 = vmatmul.msk.f32.gmra.mxu0 %vm1069_vm4, %v1060_v50  ;;  %2354 = vmatmul.msk.f32.gmra.mxu1 %vm1069_vm4, %v991_v49 }
 0x23b   : > { %v994_v51 = vpop.f32.mrf.mxu2  ;;  %v1063_v52 = vpop.f32.mrf.mxu3 }
 0x23c   : > { %2347 = vmatmul.msk.f32.gmra.mxu0 %vm1069_vm4, %v1063_v52  ;;  %2355 = vmatmul.msk.f32.gmra.mxu1 %vm1069_vm4, %v994_v51  ;;  %v1390_v52 = vld [vmem:[#allocation2] sm:$0xff] }
 0x243   : > { %v1241_v53 = vpop.f32.mrf.mxu2 }
 0x244   : > { %2373 = vmatmul.msk.f32.vlgmr.msrb.gmra.mxu3 %vm1069_vm4, %v1241_v53  ;;  %v1458_v53 = vld [vmem:[#allocation2 + $0x38] sm:$0xff] }
 0x24b   : > { %v1244_v54 = vpop.f32.mrf.mxu2 }
 0x24c   : > { %2374 = vmatmul.msk.f32.gmra.mxu3 %vm1069_vm4, %v1244_v54  ;;  %v1391_v54 = vld [vmem:[#allocation2 + $0x8] sm:$0xff] }
 0x253   : > { %v1247_v55 = vpop.f32.mrf.mxu2 }
 0x254   : > { %2375 = vmatmul.msk.f32.gmra.mxu3 %vm1069_vm4, %v1247_v55  ;;  %v1459_v55 = vld [vmem:[#allocation2 + $0x40] sm:$0xff] }
 0x25b   : > { %v1250_v56 = vpop.f32.mrf.mxu2 }
 0x25c   : > { %2376 = vmatmul.msk.f32.gmra.mxu3 %vm1069_vm4, %v1250_v56  ;;  %v1392_v56 = vld [vmem:[#allocation2 + $0x10] sm:$0xff] }
 0x263   : > { %v1253_v57 = vpop.f32.mrf.mxu2 }
 0x264   : > { %2377 = vmatmul.msk.f32.gmra.mxu3 %vm1069_vm4, %v1253_v57  ;;  %v1460_v57 = vld [vmem:[#allocation2 + $0x48] sm:$0xff] }
 0x26b   : > { %v1256_v58 = vpop.f32.mrf.mxu2 }
 0x26c   : > { %2378 = vmatmul.msk.f32.gmra.mxu3 %vm1069_vm4, %v1256_v58  ;;  %v1393_v58 = vld [vmem:[#allocation2 + $0x18] sm:$0xff] }
 0x273   : > { %v1259_v59 = vpop.f32.mrf.mxu2 }
 0x274   : > { %2379 = vmatmul.msk.f32.gmra.mxu3 %vm1069_vm4, %v1259_v59  ;;  %v1461_v59 = vld [vmem:[#allocation2 + $0x50] sm:$0xff] }
 0x289   : > { %v1112_v60 = vpop.f32.mrf.mxu0  ;;  %v1174_v61 = vpop.f32.mrf.mxu1 }
 0x28a   : > { %v1175_v36 = vadd.f32 %v1174_v61, %v1112_v60  ;;  %v1394_v60 = vld [vmem:[#allocation2 + $0x20] sm:$0xff]  ;;  %v1462_v61 = vld [vmem:[#allocation2 + $0x58] sm:$0xff] }
 0x291   : > { %v1115_v62 = vpop.f32.mrf.mxu0  ;;  %v1177_v63 = vpop.f32.mrf.mxu1 }
 0x292   : > { %v1178_v32 = vadd.f32 %v1177_v63, %v1115_v62  ;;  %v1395_v62 = vld [vmem:[#allocation2 + $0x28] sm:$0xff]  ;;  %v1463_v63 = vld [vmem:[#allocation2 + $0x60] sm:$0xff] }
 0x299   : > { %v1118_v1 = vpop.f32.mrf.mxu0  ;;  %v1180_v2 = vpop.f32.mrf.mxu1 }
 0x29a   : > { %v1181_v28 = vadd.f32 %v1180_v2, %v1118_v1  ;;  %v1464_v1 = vld [vmem:[#allocation2 + $0x68] sm:$0xff]  ;;  %v1653_v2 = vld [vmem:[#allocation2 + $0x70] sm:$0xff] }
 0x2a1   : > { %v1121_v4 = vpop.f32.mrf.mxu0  ;;  %v1183_v5 = vpop.f32.mrf.mxu1 }
 0x2a2   : > { %v1184_v24 = vadd.f32 %v1183_v5, %v1121_v4  ;;  %v1655_v4 = vld [vmem:[#allocation2 + $0x80] sm:$0xff]  ;;  %v1656_v5 = vld [vmem:[#allocation2 + $0x88] sm:$0xff] }
 0x2a9   : > { %v1124_v7 = vpop.f32.mrf.mxu0  ;;  %v1186_v8 = vpop.f32.mrf.mxu1 }
 0x2aa   : > { %v1187_v19 = vadd.f32 %v1186_v8, %v1124_v7  ;;  %v1658_v7 = vld [vmem:[#allocation2 + $0x98] sm:$0xff]  ;;  %v2394_v8 = vld [vmem:[%s3156_s8 + $0x8] sm:$0x7f] }
 0x2ab   : > { %2395 = vmatpush.msk.msra.mxu2 %vm1548_vm5, %v2394_v8 }
 0x2b1   : > { %v1127_v11 = vpop.f32.mrf.mxu0  ;;  %v1189_v12 = vpop.f32.mrf.mxu1 }
 0x2b2   : > { %v1190_v17 = vadd.f32 %v1189_v12, %v1127_v11 }
 0x2b9   : > { %v1130_v15 = vpop.f32.mrf.mxu0  ;;  %v1192_v16 = vpop.f32.mrf.mxu1 }
 0x2ba   : > { %v1193_v20 = vadd.f32 %v1192_v16, %v1130_v15  ;;  %v2418_v15 = vld [vmem:[%s3156_s8 + $0x10] sm:$0x7f] }
 0x2c7   : > { %v1306_v0 = vpop.f32.mrf.mxu3 }
 0x2c8   : > { %v1327_v41 = vadd.f32 %v1306_v0, %v1175_v36  ;;  %v1396_v0 = vld [vmem:[#allocation2 + $0x30] sm:$0xff] }
 0x2ca   : > { %v1376_v48 = vadd.f32 %v1344_v47, %v1327_v41 }
 0x2cc   : > { %v1383_v51 = vmax.f32 %v1376_v48, 0.0 }
 0x2cf   : > { %v1309_v3 = vpop.f32.mrf.mxu3 }
 0x2d0   : > { %v1328_v37 = vadd.f32 %v1309_v3, %v1178_v32  ;;  %v1654_v3 = vld [vmem:[#allocation2 + $0x78] sm:$0xff] }
 0x2d2   : > { %v1377_v45 = vadd.f32 %v1349_v44, %v1328_v37 }
 0x2d4   : > { %v1384_v50 = vmax.f32 %v1377_v45, 0.0 }
 0x2d7   : > { %v1312_v6 = vpop.f32.mrf.mxu3 }
 0x2d8   : > { %v1329_v33 = vadd.f32 %v1312_v6, %v1181_v28  ;;  %v1657_v6 = vld [vmem:[#allocation2 + $0x90] sm:$0xff] }
 0x2da   : > { %v1378_v42 = vadd.f32 %v1354_v40, %v1329_v33 }
 0x2dc   : > { %v1385_v49 = vmax.f32 %v1378_v42, 0.0 }
 0x2df   : > { %v1315_v9 = vpop.f32.mrf.mxu3 }
 0x2e0   : > { %v1330_v29 = vadd.f32 %v1315_v9, %v1184_v24  ;;  %v1456_v9 = vld [vmem:[%s3156_s8] sm:$0x7f] }
 0x2e1   : > { %2403 = vmatpush.msk.msra.mxu3 %vm1548_vm5, %v1456_v9 }
 0x2e2   : > { %v1379_v38 = vadd.f32 %v1359_v27, %v1330_v29 }
 0x2e4   : > { %v1386_v46 = vmax.f32 %v1379_v38, 0.0 }
 0x2e7   : > { %v1318_v10 = vpop.f32.mrf.mxu3 }
 0x2e8   : > { %v1331_v25 = vadd.f32 %v1318_v10, %v1187_v19  ;;  %v1659_v10 = vld [vmem:[#allocation2 + $0xa0] sm:$0xff] }
 0x2ea   : > { %v1380_v34 = vadd.f32 %v1364_v22, %v1331_v25 }
 0x2ec   : > { %v1387_v43 = vmax.f32 %v1380_v34, 0.0 }
 0x2ef   : > { %v1321_v14 = vpop.f32.mrf.mxu3 }
 0x2f0   : > { %v1332_v21 = vadd.f32 %v1321_v14, %v1190_v17 }
 0x2f2   : > { %v1381_v30 = vadd.f32 %v1369_v18, %v1332_v21 }
 0x2f4   : > { %v1388_v39 = vmax.f32 %v1381_v30, 0.0 }
 0x2f7   : > { %v1324_v23 = vpop.f32.mrf.mxu3 }
 0x2f8   : > { %v1333_v26 = vadd.f32 %v1324_v23, %v1193_v20 }
 0x2fa   : > { %v1382_v31 = vadd.f32 %v1374_v13, %v1333_v26 }
 0x2fc   : > { %v1389_v35 = vmax.f32 %v1382_v31, 0.0 }
 0x2fe   : > { %1427 = vmatpush.msrb.mxu0 %v1389_v35  ;;  %1495 = vmatpush.msrb.mxu1 %v1389_v35 }
 0x300   : > { %1428 = vmatpush.msrb.mxu0 %v1388_v39  ;;  %1496 = vmatpush.msrb.mxu1 %v1388_v39 }
 0x302   : > { %1429 = vmatpush.msrb.mxu0 %v1387_v43  ;;  %1497 = vmatpush.msrb.mxu1 %v1387_v43 }
 0x304   : > { %1430 = vmatpush.msrb.mxu0 %v1386_v46  ;;  %1498 = vmatpush.msrb.mxu1 %v1386_v46 }
 0x306   : > { %1431 = vmatpush.msrb.mxu0 %v1385_v49  ;;  %1499 = vmatpush.msrb.mxu1 %v1385_v49 }
 0x308   : > { %1432 = vmatpush.msrb.mxu0 %v1384_v50  ;;  %1500 = vmatpush.msrb.mxu1 %v1384_v50 }
 0x30a   : > { %1433 = vmatpush.msrb.mxu0 %v1383_v51  ;;  %1501 = vmatpush.msrb.mxu1 %v1383_v51 }
 0x30b   : > { %2380 = vmatmul.msk.f32.vlgmr.msrb.gmra.mxu0 %vm937_vm2, %v1390_v52  ;;  %2387 = vmatmul.msk.f32.vlgmr.msrb.gmra.mxu1 %vm937_vm2, %v1458_v53 }
 0x30c   : > { %1690 = vmatpush.msra.mxu0 %v1389_v35  ;;  %2419 = vmatpush.msk.msra.mxu1 %vm1548_vm5, %v2418_v15 }
 0x30e   : > { %1691 = vmatpush.msra.mxu0 %v1388_v39 }
 0x310   : > { %1692 = vmatpush.msra.mxu0 %v1387_v43 }
 0x312   : > { %1693 = vmatpush.msra.mxu0 %v1386_v46 }
 0x313   : > { %2381 = vmatmul.msk.f32.gmra.mxu0 %vm937_vm2, %v1391_v54  ;;  %2388 = vmatmul.msk.f32.gmra.mxu1 %vm937_vm2, %v1459_v55  ;;  %v1825_v55 = vpop.permute.xlu0 %1824 }
 0x314   : > { %1694 = vmatpush.msra.mxu0 %v1385_v49 }
 0x316   : > { %1695 = vmatpush.msra.mxu0 %v1384_v50  ;;  %v1830_v50 = vpop.permute.xlu2 %1829 }
 0x318   : > { %1696 = vmatpush.msra.mxu0 %v1383_v51 }
 0x31b   : > { %2382 = vmatmul.msk.f32.gmra.mxu0 %vm937_vm2, %v1392_v56  ;;  %2389 = vmatmul.msk.f32.gmra.mxu1 %vm937_vm2, %v1460_v57 }
 0x323   : > { %2383 = vmatmul.msk.f32.gmra.mxu0 %vm937_vm2, %v1393_v58  ;;  %2390 = vmatmul.msk.f32.gmra.mxu1 %vm937_vm2, %v1461_v59  ;;  %v1820_v59 = vpop.permute.xlu1 %1819 }
 0x32b   : > { %2384 = vmatmul.msk.f32.gmra.mxu0 %vm937_vm2, %v1394_v60  ;;  %2391 = vmatmul.msk.f32.gmra.mxu1 %vm937_vm2, %v1462_v61 }
 0x333   : > { %2385 = vmatmul.msk.f32.gmra.mxu0 %vm937_vm2, %v1395_v62  ;;  %2392 = vmatmul.msk.f32.gmra.mxu1 %vm937_vm2, %v1463_v63 }
 0x33b   : > { %2386 = vmatmul.msk.f32.gmra.mxu0 %vm937_vm2, %v1396_v0  ;;  %2393 = vmatmul.msk.f32.gmra.mxu1 %vm937_vm2, %v1464_v1  ;;  %v1815_v0 = vpop.permute.xlu2 %1814 }
 0x343   : > { %2411 = vmatmul.msk.f32.vlgmr.msra.gmra.mxu0 %vm937_vm2, %v1653_v2 }
 0x34b   : > { %2412 = vmatmul.msk.f32.gmra.mxu0 %vm937_vm2, %v1654_v3 }
 0x353   : > { %2413 = vmatmul.msk.f32.gmra.mxu0 %vm937_vm2, %v1655_v4 }
 0x35b   : > { %2414 = vmatmul.msk.f32.gmra.mxu0 %vm937_vm2, %v1656_v5 }
 0x363   : > { %2415 = vmatmul.msk.f32.gmra.mxu0 %vm937_vm2, %v1657_v6 }
 0x36b   : > { %2416 = vmatmul.msk.f32.gmra.mxu0 %vm937_vm2, %v1658_v7 }
 0x373   : > { %2417 = vmatmul.msk.f32.gmra.mxu0 %vm937_vm2, %v1659_v10 }
 0x388   : > { %v1435_v11 = vpop.f32.mrf.mxu0  ;;  %v1503_v12 = vpop.f32.mrf.mxu1 }
 0x389   : > { %2396 = vmatmul.msk.f32.vlgmr.msra.gmra.mxu2 %vm1526_vm6, %v1503_v12  ;;  %2404 = vmatmul.msk.f32.vlgmr.msra.gmra.mxu3 %vm1526_vm6, %v1435_v11 }
 0x390   : > { %v1438_v13 = vpop.f32.mrf.mxu0  ;;  %v1506_v14 = vpop.f32.mrf.mxu1 }
 0x391   : > { %2397 = vmatmul.msk.f32.gmra.mxu2 %vm1526_vm6, %v1506_v14  ;;  %2405 = vmatmul.msk.f32.gmra.mxu3 %vm1526_vm6, %v1438_v13  ;;  %v1810_v13 = vpop.permute.xlu0 %1809 }
 0x398   : > { %v1441_v16 = vpop.f32.mrf.mxu0  ;;  %v1509_v17 = vpop.f32.mrf.mxu1 }
 0x399   : > { %2398 = vmatmul.msk.f32.gmra.mxu2 %vm1526_vm6, %v1509_v17  ;;  %2406 = vmatmul.msk.f32.gmra.mxu3 %vm1526_vm6, %v1441_v16  ;;  %v1805_v17 = vpop.permute.xlu1 %1804 }
 0x3a0   : > { %v1444_v18 = vpop.f32.mrf.mxu0  ;;  %v1512_v19 = vpop.f32.mrf.mxu1 }
 0x3a1   : > { %2399 = vmatmul.msk.f32.gmra.mxu2 %vm1526_vm6, %v1512_v19  ;;  %2407 = vmatmul.msk.f32.gmra.mxu3 %vm1526_vm6, %v1444_v18 }
 0x3a8   : > { %v1447_v20 = vpop.f32.mrf.mxu0  ;;  %v1515_v21 = vpop.f32.mrf.mxu1 }
 0x3a9   : > { %2400 = vmatmul.msk.f32.gmra.mxu2 %vm1526_vm6, %v1515_v21  ;;  %2408 = vmatmul.msk.f32.gmra.mxu3 %vm1526_vm6, %v1447_v20  ;;  %v1800_v20 = vpop.permute.xlu2 %1799 }
 0x3b0   : > { %v1450_v22 = vpop.f32.mrf.mxu0  ;;  %v1518_v23 = vpop.f32.mrf.mxu1 }
 0x3b1   : > { %2401 = vmatmul.msk.f32.gmra.mxu2 %vm1526_vm6, %v1518_v23  ;;  %2409 = vmatmul.msk.f32.gmra.mxu3 %vm1526_vm6, %v1450_v22  ;;  %v2460_v23 = vld [vmem:[%s3159_s11 + $0x28] sm:$0x3f] }
 0x3b2   : > { %2461 = vmatpush.msk.msrb.mxu1 %vm1091_vm3, %v2460_v23 }
 0x3b8   : > { %v1453_v24 = vpop.f32.mrf.mxu0  ;;  %v1521_v25 = vpop.f32.mrf.mxu1 }
 0x3b9   : > { %2402 = vmatmul.msk.f32.gmra.mxu2 %vm1526_vm6, %v1521_v25  ;;  %2410 = vmatmul.msk.f32.gmra.mxu3 %vm1526_vm6, %v1453_v24 }
 0x3c0   : > { %v1698_v26 = vpop.f32.mrf.mxu0 }
 0x3c1   : > { %2420 = vmatmul.msk.f32.vlgmr.msra.gmra.mxu1 %vm1526_vm6, %v1698_v26  ;;  %v1846_v26 = vld [vmem:[%s3158_s10] sm:$0xff] }
 0x3c8   : > { %v1701_v27 = vpop.f32.mrf.mxu0 }
 0x3c9   : > { %2421 = vmatmul.msk.f32.gmra.mxu1 %vm1526_vm6, %v1701_v27  ;;  %v2431_v27 = vld [vmem:[%s3158_s10 + $0x20] sm:$0xff] }
 0x3d0   : > { %v1704_v28 = vpop.f32.mrf.mxu0 }
 0x3d1   : > { %2422 = vmatmul.msk.f32.gmra.mxu1 %vm1526_vm6, %v1704_v28  ;;  %v2451_v28 = vld [vmem:[%s3158_s10 + $0x40] sm:$0xff] }
 0x3d8   : > { %v1707_v29 = vpop.f32.mrf.mxu0 }
 0x3d9   : > { %2423 = vmatmul.msk.f32.gmra.mxu1 %vm1526_vm6, %v1707_v29  ;;  %v2440_v29 = vld [vmem:[%s3159_s11 + $0x18] sm:$0x3f] }
 0x3e0   : > { %v1710_v30 = vpop.f32.mrf.mxu0 }
 0x3e1   : > { %2424 = vmatmul.msk.f32.gmra.mxu1 %vm1526_vm6, %v1710_v30  ;;  %v1892_v30 = vld [vmem:[%s3159_s11 + $0x8] sm:$0x3f] }
 0x3e8   : > { %v1713_v31 = vpop.f32.mrf.mxu0 }
 0x3e9   : > { %2425 = vmatmul.msk.f32.gmra.mxu1 %vm1526_vm6, %v1713_v31  ;;  %v1847_v31 = vld [vmem:[%s3158_s10 + $0x8] sm:$0xff] }
 0x3f0   : > { %v1716_v32 = vpop.f32.mrf.mxu0 }
 0x3f1   : > { %2426 = vmatmul.msk.f32.gmra.mxu1 %vm1526_vm6, %v1716_v32  ;;  %v2432_v32 = vld [vmem:[%s3158_s10 + $0x28] sm:$0xff] }
 0x40c   : > { %v1569_v33 = vpop.f32.mrf.mxu2  ;;  %v1631_v34 = vpop.f32.mrf.mxu3 }
 0x40d   : > { %v1632_v9 = vadd.f32 %v1631_v34, %v1569_v33  ;;  %v2452_v33 = vld [vmem:[%s3158_s10 + $0x48] sm:$0xff]  ;;  %v1848_v34 = vld [vmem:[%s3158_s10 + $0x10] sm:$0xff] }
 0x414   : > { %v1572_v35 = vpop.f32.mrf.mxu2  ;;  %v1634_v36 = vpop.f32.mrf.mxu3 }
 0x415   : > { %v1635_v5 = vadd.f32 %v1634_v36, %v1572_v35  ;;  %v2433_v35 = vld [vmem:[%s3158_s10 + $0x30] sm:$0xff] }
 0x416   : > { %v2453_v36 = vld [vmem:[%s3158_s10 + $0x50] sm:$0xff] }
 0x41c   : > { %v1575_v38 = vpop.f32.mrf.mxu2  ;;  %v1637_v39 = vpop.f32.mrf.mxu3 }
 0x41d   : > { %v1638_v1 = vadd.f32 %v1637_v39, %v1575_v38  ;;  %v2434_v38 = vld [vmem:[%s3158_s10 + $0x38] sm:$0x7] }
 0x41e   : > { %v2454_v39 = vld [vmem:[%s3158_s10 + $0x58] sm:$0x7] }
 0x424   : > { %v1578_v41 = vpop.f32.mrf.mxu2  ;;  %v1640_v42 = vpop.f32.mrf.mxu3 }
 0x425   : > { %v1641_v61 = vadd.f32 %v1640_v42, %v1578_v41  ;;  %v1891_v41 = vld [vmem:[%s3159_s11] sm:$0xff] }
 0x426   : > { %v2459_v42 = vld [vmem:[%s3159_s11 + $0x20] sm:$0xff] }
 0x427   : > { %2109 = vmatpush.msrb.mxu1 %v2459_v42 }
 0x42c   : > { %v1581_v44 = vpop.f32.mrf.mxu2  ;;  %v1643_v45 = vpop.f32.mrf.mxu3 }
 0x42d   : > { %v1644_v56 = vadd.f32 %v1643_v45, %v1581_v44 }
 0x434   : > { %v1584_v48 = vpop.f32.mrf.mxu2  ;;  %v1646_v49 = vpop.f32.mrf.mxu3 }
 0x435   : > { %v1647_v54 = vadd.f32 %v1646_v49, %v1584_v48 }
 0x43c   : > { %v1587_v52 = vpop.f32.mrf.mxu2  ;;  %v1649_v53 = vpop.f32.mrf.mxu3 }
 0x43d   : > { %v1650_v57 = vadd.f32 %v1649_v53, %v1587_v52 }
 0x43e   : > { %v1762_v37 = vpop.f32.mrf.mxu1 }
 0x43f   : > { %v1783_v14 = vadd.f32 %v1762_v37, %v1632_v9  ;;  %v1849_v37 = vld [vmem:[%s3158_s10 + $0x18] sm:$0x7] }
 0x441   : > { %v1832_v21 = vadd.f32 %v1800_v20, %v1783_v14 }
 0x443   : > { %v1839_v25 = vmax.f32 %v1832_v21, 0.0 }
 0x446   : > { %v1765_v40 = vpop.f32.mrf.mxu1 }
 0x447   : > { %v1784_v10 = vadd.f32 %v1765_v40, %v1635_v5  ;;  %v2439_v40 = vld [vmem:[%s3159_s11 + $0x10] sm:$0xff] }
 0x449   : > { %v1833_v18 = vadd.f32 %v1805_v17, %v1784_v10 }
 0x44b   : > { %v1840_v24 = vmax.f32 %v1833_v18, 0.0 }
 0x44e   : > { %v1768_v43 = vpop.f32.mrf.mxu1 }
 0x44f   : > { %v1785_v6 = vadd.f32 %v1768_v43, %v1638_v1 }
 0x451   : > { %v1834_v15 = vadd.f32 %v1810_v13, %v1785_v6  ;;  %v2144_v13 = vpop.permute.xlu2 %2143 }
 0x453   : > { %v1841_v22 = vmax.f32 %v1834_v15, 0.0 }
 0x456   : > { %v1771_v46 = vpop.f32.mrf.mxu1 }
 0x457   : > { %v1786_v2 = vadd.f32 %v1771_v46, %v1641_v61 }
 0x459   : > { %v1835_v11 = vadd.f32 %v1815_v0, %v1786_v2 }
 0x45b   : > { %v1842_v19 = vmax.f32 %v1835_v11, 0.0 }
 0x45e   : > { %v1774_v47 = vpop.f32.mrf.mxu1 }
 0x45f   : > { %v1787_v62 = vadd.f32 %v1774_v47, %v1644_v56 }
 0x461   : > { %v1836_v7 = vadd.f32 %v1820_v59, %v1787_v62 }
 0x463   : > { %v1843_v16 = vmax.f32 %v1836_v7, 0.0 }
 0x466   : > { %v1777_v51 = vpop.f32.mrf.mxu1 }
 0x467   : > { %v1788_v58 = vadd.f32 %v1777_v51, %v1647_v54 }
 0x469   : > { %v1837_v3 = vadd.f32 %v1825_v55, %v1788_v58 }
 0x46b   : > { %v1844_v12 = vmax.f32 %v1837_v3, 0.0 }
 0x46e   : > { %v1780_v60 = vpop.f32.mrf.mxu1 }
 0x46f   : > { %v1789_v63 = vadd.f32 %v1780_v60, %v1650_v57  ;;  %v2134_v60 = vpop.permute.xlu0 %2133 }
 0x471   : > { %v1838_v4 = vadd.f32 %v1830_v50, %v1789_v63 }
 0x473   : > { %v1845_v8 = vmax.f32 %v1838_v4, 0.0  ;;  %v2139_v4 = vpop.permute.xlu1 %2138 }
 0x475   : > { %1871 = vmatpush.msrb.mxu2 %v1845_v8  ;;  %1919 = vmatpush.msrb.mxu3 %v1845_v8 }
 0x476   : > { %2056 = vmatpush.msrb.mxu0 %v1845_v8 }
 0x477   : > { %1872 = vmatpush.msrb.mxu2 %v1844_v12  ;;  %1920 = vmatpush.msrb.mxu3 %v1844_v12 }
 0x478   : > { %2057 = vmatpush.msrb.mxu0 %v1844_v12 }
 0x479   : > { %1873 = vmatpush.msrb.mxu2 %v1843_v16  ;;  %1921 = vmatpush.msrb.mxu3 %v1843_v16 }
 0x47a   : > { %2058 = vmatpush.msrb.mxu0 %v1843_v16 }
 0x47b   : > { %1874 = vmatpush.msrb.mxu2 %v1842_v19  ;;  %1922 = vmatpush.msrb.mxu3 %v1842_v19 }
 0x47c   : > { %2059 = vmatpush.msrb.mxu0 %v1842_v19 }
 0x47d   : > { %1875 = vmatpush.msrb.mxu2 %v1841_v22  ;;  %1923 = vmatpush.msrb.mxu3 %v1841_v22 }
 0x47e   : > { %2060 = vmatpush.msrb.mxu0 %v1841_v22  ;;  %v2149_v22 = vpop.permute.xlu0 %2148 }
 0x47f   : > { %1876 = vmatpush.msrb.mxu2 %v1840_v24  ;;  %1924 = vmatpush.msrb.mxu3 %v1840_v24 }
 0x480   : > { %2061 = vmatpush.msrb.mxu0 %v1840_v24 }
 0x481   : > { %1877 = vmatpush.msrb.mxu2 %v1839_v25  ;;  %1925 = vmatpush.msrb.mxu3 %v1839_v25 }
 0x482   : > { %2062 = vmatpush.msrb.mxu0 %v1839_v25  ;;  %2427 = vmatmul.msk.f32.vlgmr.msrb.gmra.mxu2 %vm937_vm2, %v1846_v26 }
 0x483   : > { %2435 = vmatmul.msk.f32.vlgmr.msrb.gmra.mxu3 %vm937_vm2, %v2431_v27  ;;  %2455 = vmatmul.msk.f32.vlgmr.msrb.gmra.mxu0 %vm937_vm2, %v2451_v28 }
 0x484   : > { %2441 = vmatpush.msk.msra.mxu2 %vm1091_vm3, %v2440_v29  ;;  %2446 = vmatpush.msk.msra.mxu3 %vm1091_vm3, %v1892_v30 }
 0x486   : > { %1972 = vmatpush.msra.mxu2 %v2439_v40  ;;  %2016 = vmatpush.msra.mxu3 %v1891_v41 }
 0x48a   : > { %2428 = vmatmul.msk.f32.gmra.mxu2 %vm937_vm2, %v1847_v31 }
 0x48b   : > { %2436 = vmatmul.msk.f32.gmra.mxu3 %vm937_vm2, %v2432_v32  ;;  %2456 = vmatmul.msk.f32.gmra.mxu0 %vm937_vm2, %v2452_v33 }
 0x492   : > { %2429 = vmatmul.msk.f32.gmra.mxu2 %vm937_vm2, %v1848_v34 }
 0x493   : > { %2437 = vmatmul.msk.f32.gmra.mxu3 %vm937_vm2, %v2433_v35  ;;  %2457 = vmatmul.msk.f32.gmra.mxu0 %vm937_vm2, %v2453_v36 }
 0x49a   : > { %2430 = vmatmul.msk.f32.gmra.mxu2 %vm937_vm2, %v1849_v37 }
 0x49b   : > { %2438 = vmatmul.msk.f32.gmra.mxu3 %vm937_vm2, %v2434_v38  ;;  %2458 = vmatmul.msk.f32.gmra.mxu0 %vm937_vm2, %v2454_v39 }
 0x500   : > { %v2064_v43 = vpop.f32.mrf.mxu0 }
 0x501   : > { %2462 = vmatmul.msk.f32.vlgmr.msrb.gmra.mxu1 %vm1069_vm4, %v2064_v43 }
 0x505   : > { %v1879_v44 = vpop.f32.mrf.mxu2 }
 0x506   : > { %v1927_v45 = vpop.f32.mrf.mxu3  ;;  %2447 = vmatmul.msk.f32.vlgmr.msra.gmra.mxu3 %vm1069_vm4, %v1879_v44 }
 0x507   : > { %2442 = vmatmul.msk.f32.vlgmr.msra.gmra.mxu2 %vm1069_vm4, %v1927_v45 }
 0x508   : > { %v2067_v46 = vpop.f32.mrf.mxu0 }
 0x509   : > { %2463 = vmatmul.msk.f32.gmra.mxu1 %vm1069_vm4, %v2067_v46 }
 0x50d   : > { %v1882_v47 = vpop.f32.mrf.mxu2 }
 0x50e   : > { %v1930_v48 = vpop.f32.mrf.mxu3  ;;  %2448 = vmatmul.msk.f32.gmra.mxu3 %vm1069_vm4, %v1882_v47 }
 0x50f   : > { %2443 = vmatmul.msk.f32.gmra.mxu2 %vm1069_vm4, %v1930_v48 }
 0x510   : > { %v2070_v49 = vpop.f32.mrf.mxu0 }
 0x511   : > { %2464 = vmatmul.msk.f32.gmra.mxu1 %vm1069_vm4, %v2070_v49 }
 0x515   : > { %v1885_v50 = vpop.f32.mrf.mxu2 }
 0x516   : > { %v1933_v51 = vpop.f32.mrf.mxu3  ;;  %2449 = vmatmul.msk.f32.gmra.mxu3 %vm1069_vm4, %v1885_v50 }
 0x517   : > { %2444 = vmatmul.msk.f32.gmra.mxu2 %vm1069_vm4, %v1933_v51 }
 0x518   : > { %v2073_v52 = vpop.f32.mrf.mxu0 }
 0x519   : > { %2465 = vmatmul.msk.f32.gmra.mxu1 %vm1069_vm4, %v2073_v52 }
 0x51d   : > { %v1888_v53 = vpop.f32.mrf.mxu2 }
 0x51e   : > { %v1936_v54 = vpop.f32.mrf.mxu3  ;;  %2450 = vmatmul.msk.f32.gmra.mxu3 %vm1069_vm4, %v1888_v53 }
 0x51f   : > { %2445 = vmatmul.msk.f32.gmra.mxu2 %vm1069_vm4, %v1936_v54 }
 0x57e   : > { %v2111_v55 = vpop.f32.mrf.mxu1 }
 0x586   : > { %v2114_v61 = vpop.f32.mrf.mxu1 }
 0x589   : > { %v2018_v56 = vpop.f32.mrf.mxu3 }
 0x58a   : > { %v1974_v57 = vpop.f32.mrf.mxu2 }
 0x58b   : > { %v2019_v58 = vadd.f32 %v2018_v56, %v1974_v57 }
 0x58d   : > { %v2123_v59 = vadd.f32 %v2111_v55, %v2019_v58 }
 0x58e   : > { %v2117_v6 = vpop.f32.mrf.mxu1 }
 0x58f   : > { %v2151_v62 = vadd.f32 %v2134_v60, %v2123_v59 }
 0x591   : > { %v2155_v63 = vmax.f32 %v2151_v62, 0.0  ;;  %v2021_v0 = vpop.f32.mrf.mxu3 }
 0x592   : > { %v1977_v1 = vpop.f32.mrf.mxu2 }
 0x593   : > { %2503 = vtanh.f32 %v2155_v63  ;;  %v2022_v2 = vadd.f32 %v2021_v0, %v1977_v1 }
 0x595   : > { %v2124_v3 = vadd.f32 %v2114_v61, %v2022_v2 }
 0x596   : > { %v2120_v19 = vpop.f32.mrf.mxu1 }
 0x597   : > { %v2152_v5 = vadd.f32 %v2139_v4, %v2124_v3 }
 0x599   : > { %v2504_v7 = vpop.eup %2503  ;;  %v2156_v8 = vmax.f32 %v2152_v5, 0.0  ;;  %v2024_v9 = vpop.f32.mrf.mxu3 }
 0x59a   : > { %2164 = vst.msk [vmem:[%s3136_s26] sm:$0xff] %vm2163_vm7, %v2504_v7  ;;  %v1980_v10 = vpop.f32.mrf.mxu2 }
 0x59b   : > { %2505 = vtanh.f32 %v2156_v8  ;;  %v2025_v11 = vadd.f32 %v2024_v9, %v1980_v10 }
 0x59d   : > { %v2125_v12 = vadd.f32 %v2117_v6, %v2025_v11 }
 0x59f   : > { %v2153_v14 = vadd.f32 %v2144_v13, %v2125_v12 }
 0x5a1   : > { %v2506_v15 = vpop.eup %2505  ;;  %v2157_v16 = vmax.f32 %v2153_v14, 0.0  ;;  %v2027_v17 = vpop.f32.mrf.mxu3 }
 0x5a2   : > { %2165 = vst.msk [vmem:[%s3136_s26 + $0x8] sm:$0xff] %vm2163_vm7, %v2506_v15  ;;  %v1983_v18 = vpop.f32.mrf.mxu2 }
 0x5a3   : > { %2507 = vtanh.f32 %v2157_v16  ;;  %v2028_v20 = vadd.f32 %v2027_v17, %v1983_v18 }
 0x5a5   : > { %v2126_v21 = vadd.f32 %v2120_v19, %v2028_v20 }
 0x5a7   : > { %v2154_v23 = vadd.f32 %v2149_v22, %v2126_v21 }
 0x5a9   : > { %v2508_v24 = vpop.eup %2507  ;;  %v2158_v25 = vmax.f32 %v2154_v23, 0.0 }
 0x5aa   : > { %2166 = vst.msk [vmem:[%s3136_s26 + $0x10] sm:$0xff] %vm2163_vm7, %v2508_v24 }
 0x5ab   : > { %2509 = vtanh.f32 %v2158_v25 }
 0x5b1   : > { %v2510_v26 = vpop.eup %2509 }
 0x5b2   : > { %2168 = vst.msk [vmem:[%s3136_s26 + $0x18] sm:$0x7] %vm2167_vm8, %v2510_v26 }
 0x5b3 PF: > { %s24_s25 = sadd.s32 1, %s2551_s25  }
 0x5b4   : > { %p21_p7 = scmp.ge.s32.totalorder %s24_s25, 4  }
 0x5b6   :  { %23 = sbr.rel (!%p21_p7) target bundleno = 1 (0x1), region = 123 }
 0x5bb   :  { %2190 = vsyncpa [#allocation3], 1 }
 0x5bc   :  { %2192 = vsyncpa [#allocation3 + $0x1], 1 }

</bundles_post_ra>
